<compile_context>
chip_gen: v7x
topology: tpu7x:2x2x1
jax: 0.10.0
libtpu: 0.0.40
codegen_flags: <defaults>
</compile_context>

<pallas_src>
import math
import functools

import jax
import jax.numpy as jnp
from jax import lax
from jax.experimental import pallas as pl
from jax.experimental.pallas import tpu as pltpu


def clip_layer_kernel(x_ref,
                      ln1_g_ref, ln1_b_ref,
                      w_qkv_ref, b_qkv_ref,
                      w_out_ref, b_out_ref,
                      ln2_g_ref, ln2_b_ref,
                      w1_ref, b1_ref,
                      w2_ref, b2_ref,
                      o_ref,
                      *, n_head: int, d_head: int, eps: float):
    BB, S, D = x_ref.shape
    M = BB * S

    # Flatten the batch block so every projection GEMM sees M = BB*S rows.
    x = x_ref[...].astype(jnp.float32).reshape(M, D)                       # (M, D) f32

    # ---------- LayerNorm 1 ----------
    mu = jnp.mean(x, axis=-1, keepdims=True)
    var = jnp.mean(jnp.square(x - mu), axis=-1, keepdims=True)
    h = (x - mu) * lax.rsqrt(var + eps)
    h = h * ln1_g_ref[0] + ln1_b_ref[0]

    # ---------- QKV projection (bf16 operands, f32 accumulate on MXU) ----------
    # 1/sqrt(d_head) is pre-folded into the Q columns of w_qkv / b_qkv in the wrapper.
    qkv = jnp.dot(h.astype(jnp.bfloat16), w_qkv_ref[...],
                  preferred_element_type=jnp.float32) + b_qkv_ref[0]       # (M, 3D) f32
    qkv = qkv.astype(jnp.bfloat16)        # single cast BEFORE the head-major relayouts

    def to_heads(t):                      # (M, D) -> (BB*H, S, dh), bf16
        return (t.reshape(BB, S, n_head, d_head)
                 .transpose(0, 2, 1, 3)
                 .reshape(BB * n_head, S, d_head))

    q = to_heads(qkv[:, 0 * D:1 * D])
    k = to_heads(qkv[:, 1 * D:2 * D])
    v = to_heads(qkv[:, 2 * D:3 * D])

    # ---------- causal attention, batched over (BB*H) ----------
    s = jnp.einsum("hqd,hkd->hqk", q, k,
                   preferred_element_type=jnp.float32)                     # (BB*H, S, S) f32
    row = lax.broadcasted_iota(jnp.int32, (S, S), 0)
    col = lax.broadcasted_iota(jnp.int32, (S, S), 1)
    s = jnp.where((col <= row)[None, :, :], s, -jnp.inf)
    s = s - jnp.max(s, axis=-1, keepdims=True)
    p = jnp.exp(s)
    p = p * pl.reciprocal(jnp.sum(p, axis=-1, keepdims=True), approx=True)

    attn = jnp.einsum("hqk,hkd->hqd", p.astype(jnp.bfloat16), v,
                      preferred_element_type=jnp.float32)                  # (BB*H, S, dh)
    attn = attn.astype(jnp.bfloat16)      # cast once BEFORE the relayout back to (M, D)
    attn = (attn.reshape(BB, n_head, S, d_head)
                .transpose(0, 2, 1, 3)
                .reshape(M, D))

    attn = jnp.dot(attn, w_out_ref[...],
                   preferred_element_type=jnp.float32) + b_out_ref[0]      # (M, D) f32

    # residual 1
    x1 = attn + x

    # ---------- LayerNorm 2 ----------
    mu2 = jnp.mean(x1, axis=-1, keepdims=True)
    var2 = jnp.mean(jnp.square(x1 - mu2), axis=-1, keepdims=True)
    h2 = (x1 - mu2) * lax.rsqrt(var2 + eps)
    h2 = h2 * ln2_g_ref[0] + ln2_b_ref[0]

    # ---------- MLP with QuickGELU ----------
    z = jnp.dot(h2.astype(jnp.bfloat16), w1_ref[...],
                preferred_element_type=jnp.float32) + b1_ref[0]            # (M, 4D) f32
    z = z * jax.nn.sigmoid(1.702 * z)     # QuickGELU (f32; bf16-sigmoid is a v6e/v7x-only tweak)
    z = jnp.dot(z.astype(jnp.bfloat16), w2_ref[...],
                preferred_element_type=jnp.float32) + b2_ref[0]            # (M, D) f32

    # residual 2
    o_ref[...] = (z + x1).reshape(BB, S, D).astype(o_ref.dtype)


def clip_layer(x, params, *, n_head: int, target_rows: int = 256, bb_max: int = 8):
    B, S, D = x.shape
    assert D % n_head == 0
    d_head = D // n_head
    eps = 1e-5

    # Pad S to a multiple of 16 (bf16 sublane tile = 16 rows). Padded rows are zeros, sit at
    # the end, and are never attended to by real causal queries; sliced off afterwards.
    S_pad = ((S + 15) // 16) * 16

    # Batch block: aim for >= target_rows GEMM rows per grid step, but keep the f32 score
    # tensor (BB*H, S_pad, S_pad) under ~8 MiB and BB <= bb_max.
    BB = max(1, min(B, bb_max, -(-target_rows // S_pad)))
    while BB > 1 and 4 * BB * n_head * S_pad * S_pad > 8 * 1024 * 1024:
        BB -= 1
    B_pad = -(-B // BB) * BB

    if (B_pad, S_pad) != (B, S):
        x = jnp.pad(x, ((0, B_pad - B), (0, S_pad - S), (0, 0)))

    # Fold 1/sqrt(d_head) into the Q columns of w_qkv / b_qkv (in f32), then cast matmul
    # weights to bf16 once. LN params and biases stay f32 (added to f32 accumulators).
    scale = 1.0 / math.sqrt(d_head)
    wp = dict(params)
    wp["w_qkv"] = params["w_qkv"].at[:, :D].multiply(scale)
    wp["b_qkv"] = params["b_qkv"].at[:, :D].multiply(scale)
    for name in ("w_qkv", "w_out", "w1", "w2"):
        wp[name] = wp[name].astype(jnp.bfloat16)

    kern = functools.partial(clip_layer_kernel, n_head=n_head, d_head=d_head, eps=eps)

    def const_spec(a):
        # Grid-invariant param: fetched once; single-buffered to halve weight VMEM.
        return pl.BlockSpec(a.shape, lambda b: (0,) * a.ndim,
                            pipeline_mode=pl.Buffered(1))

    in_specs = [
        pl.BlockSpec((BB, S_pad, D), lambda b: (b, 0, 0)),    # x, BB sequences per step
        const_spec(wp["ln1_g"]), const_spec(wp["ln1_b"]),
        const_spec(wp["w_qkv"]), const_spec(wp["b_qkv"]),
        const_spec(wp["w_out"]), const_spec(wp["b_out"]),
        const_spec(wp["ln2_g"]), const_spec(wp["ln2_b"]),
        const_spec(wp["w1"]), const_spec(wp["b1"]),
        const_spec(wp["w2"]), const_spec(wp["b2"]),
    ]

    # VMEM budget: 1x weights (Buffered(1)), double-buffered x/out blocks, activation
    # temporaries (f32 + bf16 copies + score/prob tensors). Capped at 56 MiB (< v7x physical
    # 64 MiB) to leave headroom for Mosaic internal scratch.
    weight_bytes = sum(int(wp[n].size) * wp[n].dtype.itemsize for n in wp)
    io_bytes = 2 * 2 * BB * S_pad * D * x.dtype.itemsize
    act_bytes = (4 * BB * S_pad * 22 * D                 # row-wise f32/bf16 temporaries
                 + 8 * BB * n_head * S_pad * S_pad)      # scores + probs (f32)
    vmem_bytes = int(min(56 * 1024 * 1024,
                         max(32 * 1024 * 1024, weight_bytes + io_bytes + act_bytes)))

    flops = 24 * B_pad * S_pad * D * D + 4 * B_pad * S_pad * S_pad * D
    cost = pl.CostEstimate(
        flops=int(flops),
        transcendentals=int(B_pad * (n_head * S_pad * S_pad + 4 * S_pad * D)),
        bytes_accessed=int(2 * B_pad * S_pad * D * x.dtype.itemsize + weight_bytes),
    )

    out = pl.pallas_call(
        kern,
        out_shape=jax.ShapeDtypeStruct((B_pad, S_pad, D), x.dtype),
        grid=(B_pad // BB,),
        in_specs=in_specs,
        out_specs=pl.BlockSpec((BB, S_pad, D), lambda b: (b, 0, 0)),
        compiler_params=pltpu.CompilerParams(
            dimension_semantics=("parallel",),
            vmem_limit_bytes=vmem_bytes),
        cost_estimate=cost,
    )(x,
      wp["ln1_g"], wp["ln1_b"],
      wp["w_qkv"], wp["b_qkv"],
      wp["w_out"], wp["b_out"],
      wp["ln2_g"], wp["ln2_b"],
      wp["w1"], wp["b1"],
      wp["w2"], wp["b2"])

    if (B_pad, S_pad) != (B, S):
        out = out[:B, :S, :]
    return out


def clip_layer_reference(x, params, *, n_head: int):
    """Pure-JAX f32 reference mirroring the PyTorch forward."""
    B, S, D = x.shape
    d_head = D // n_head
    eps = 1e-5

    def ln(v, g, b):
        mu = jnp.mean(v, -1, keepdims=True)
        var = jnp.mean((v - mu) ** 2, -1, keepdims=True)
        return (v - mu) / jnp.sqrt(var + eps) * g[0] + b[0]

    residue = x
    h = ln(x, params["ln1_g"], params["ln1_b"])
    qkv = h @ params["w_qkv"] + params["b_qkv"][0]
    q, k, v = jnp.split(qkv, 3, axis=-1)
    q = q.reshape(B, S, n_head, d_head).transpose(0, 2, 1, 3)
    k = k.reshape(B, S, n_head, d_head).transpose(0, 2, 1, 3)
    v = v.reshape(B, S, n_head, d_head).transpose(0, 2, 1, 3)
    w = jnp.einsum("bhqd,bhkd->bhqk", q, k)
    mask = jnp.triu(jnp.ones((S, S), bool), 1)
    w = jnp.where(mask, -jnp.inf, w) / math.sqrt(d_head)
    w = jax.nn.softmax(w, axis=-1)
    o = jnp.einsum("bhqk,bhkd->bhqd", w, v).transpose(0, 2, 1, 3).reshape(B, S, D)
    o = o @ params["w_out"] + params["b_out"][0]
    x1 = o + residue
    h2 = ln(x1, params["ln2_g"], params["ln2_b"])
    z = h2 @ params["w1"] + params["b1"][0]
    z = z * jax.nn.sigmoid(1.702 * z)
    z = z @ params["w2"] + params["b2"][0]
    return z + x1


if __name__ == "__main__":
    B, S, D = 2, 8, 32
    n_head = 4
    D4 = 4 * D

    key = jax.random.PRNGKey(0)
    keys = jax.random.split(key, 12)

    # Deterministic synthetic parameters (weights as (in, out), biases/LN params as (1, out)).
    params = {
        "ln1_g": jax.random.normal(keys[0], (1, D), jnp.float32) * 0.1 + 1.0,
        "ln1_b": jax.random.normal(keys[1], (1, D), jnp.float32) * 0.1,
        "w_qkv": jax.random.normal(keys[2], (D, 3 * D), jnp.float32) * 0.05,
        "b_qkv": jax.random.normal(keys[3], (1, 3 * D), jnp.float32) * 0.05,
        "w_out": jax.random.normal(keys[4], (D, D), jnp.float32) * 0.05,
        "b_out": jax.random.normal(keys[5], (1, D), jnp.float32) * 0.05,
        "ln2_g": jax.random.normal(keys[6], (1, D), jnp.float32) * 0.1 + 1.0,
        "ln2_b": jax.random.normal(keys[7], (1, D), jnp.float32) * 0.1,
        "w1": jax.random.normal(keys[8], (D, D4), jnp.float32) * 0.05,
        "b1": jax.random.normal(keys[9], (1, D4), jnp.float32) * 0.05,
        "w2": jax.random.normal(keys[10], (D4, D), jnp.float32) * 0.05,
        "b2": jax.random.normal(keys[11], (1, D), jnp.float32) * 0.05,
    }

    x = jax.random.normal(jax.random.PRNGKey(42), (B, S, D), jnp.float32)

    out = clip_layer(x, params, n_head=n_head)
    out = jax.block_until_ready(out)

    ref = clip_layer_reference(x, params, n_head=n_head)
    assert out.shape == (B, S, D)
    # Tolerance loosened vs pure-f32 because matmul operands/weights are bf16.
    assert jnp.allclose(out, ref, atol=5e-2, rtol=5e-2), "mismatch vs JAX reference"

    print("KERNEL_OK")
</pallas_src>

<mosaic_0001>
module attributes {stable_mosaic.version = 11 : i64} {
  func.func @clip_layer_kernel(%arg0: i32, %arg1: memref<2x16x32xf32, #tpu.memory_space<vmem>>, %arg2: memref<1x32xf32, #tpu.memory_space<vmem>>, %arg3: memref<1x32xf32, #tpu.memory_space<vmem>>, %arg4: memref<32x96xbf16, #tpu.memory_space<vmem>>, %arg5: memref<1x96xf32, #tpu.memory_space<vmem>>, %arg6: memref<32x32xbf16, #tpu.memory_space<vmem>>, %arg7: memref<1x32xf32, #tpu.memory_space<vmem>>, %arg8: memref<1x32xf32, #tpu.memory_space<vmem>>, %arg9: memref<1x32xf32, #tpu.memory_space<vmem>>, %arg10: memref<32x128xbf16, #tpu.memory_space<vmem>>, %arg11: memref<1x128xf32, #tpu.memory_space<vmem>>, %arg12: memref<128x32xbf16, #tpu.memory_space<vmem>>, %arg13: memref<1x32xf32, #tpu.memory_space<vmem>>, %arg14: memref<2x16x32xf32, #tpu.memory_space<vmem>>) attributes {dimension_semantics = [#tpu.dimension_semantics<parallel>], iteration_bounds = array<i64: 1>, scalar_prefetch = 0 : i64, scratch_operands = 0 : i64, tpu.core_type = #tpu.core_type<tc>, window_params = [{transform_indices = @transform_0, window_bounds = array<i64: 2, 16, 32>}, {pipeline_mode = #tpu.pipeline_mode<synchronous>, transform_indices = @transform_1, window_bounds = array<i64: 1, 32>}, {pipeline_mode = #tpu.pipeline_mode<synchronous>, transform_indices = @transform_2, window_bounds = array<i64: 1, 32>}, {pipeline_mode = #tpu.pipeline_mode<synchronous>, transform_indices = @transform_3, window_bounds = array<i64: 32, 96>}, {pipeline_mode = #tpu.pipeline_mode<synchronous>, transform_indices = @transform_4, window_bounds = array<i64: 1, 96>}, {pipeline_mode = #tpu.pipeline_mode<synchronous>, transform_indices = @transform_5, window_bounds = array<i64: 32, 32>}, {pipeline_mode = #tpu.pipeline_mode<synchronous>, transform_indices = @transform_6, window_bounds = array<i64: 1, 32>}, {pipeline_mode = #tpu.pipeline_mode<synchronous>, transform_indices = @transform_7, window_bounds = array<i64: 1, 32>}, {pipeline_mode = #tpu.pipeline_mode<synchronous>, transform_indices = @transform_8, window_bounds = array<i64: 1, 32>}, {pipeline_mode = #tpu.pipeline_mode<synchronous>, transform_indices = @transform_9, window_bounds = array<i64: 32, 128>}, {pipeline_mode = #tpu.pipeline_mode<synchronous>, transform_indices = @transform_10, window_bounds = array<i64: 1, 128>}, {pipeline_mode = #tpu.pipeline_mode<synchronous>, transform_indices = @transform_11, window_bounds = array<i64: 128, 32>}, {pipeline_mode = #tpu.pipeline_mode<synchronous>, transform_indices = @transform_12, window_bounds = array<i64: 1, 32>}, {transform_indices = @transform_13, window_bounds = array<i64: 2, 16, 32>}]} {
    %c0 = arith.constant 0 : index
    %c0_0 = arith.constant 0 : index
    %c0_1 = arith.constant 0 : index
    %0 = vector.load %arg1[%c0, %c0_0, %c0_1] : memref<2x16x32xf32, #tpu.memory_space<vmem>>, vector<2x16x32xf32>
    %1 = vector.shape_cast %0 : vector<2x16x32xf32> to vector<32x32xf32>
    %cst = arith.constant dense<0.000000e+00> : vector<32xf32>
    %2 = vector.multi_reduction <add>, %1, %cst [1] : vector<32x32xf32> to vector<32xf32>
    %3 = vector.shape_cast %2 : vector<32xf32> to vector<32x1xf32>
    %cst_2 = arith.constant 3.200000e+01 : f32
    %4 = vector.broadcast %cst_2 : f32 to vector<32x1xf32>
    %5 = arith.divf %3, %4 : vector<32x1xf32>
    %6 = vector.broadcast %5 : vector<32x1xf32> to vector<32x32xf32>
    %7 = arith.subf %1, %6 : vector<32x32xf32>
    %8 = arith.mulf %7, %7 : vector<32x32xf32>
    %cst_3 = arith.constant dense<0.000000e+00> : vector<32xf32>
    %9 = vector.multi_reduction <add>, %8, %cst_3 [1] : vector<32x32xf32> to vector<32xf32>
    %10 = vector.shape_cast %9 : vector<32xf32> to vector<32x1xf32>
    %cst_4 = arith.constant 3.200000e+01 : f32
    %11 = vector.broadcast %cst_4 : f32 to vector<32x1xf32>
    %12 = arith.divf %10, %11 : vector<32x1xf32>
    %13 = vector.broadcast %5 : vector<32x1xf32> to vector<32x32xf32>
    %14 = arith.subf %1, %13 : vector<32x32xf32>
    %cst_5 = arith.constant 9.99999974E-6 : f32
    %15 = vector.broadcast %cst_5 : f32 to vector<32x1xf32>
    %16 = arith.addf %12, %15 : vector<32x1xf32>
    %17 = math.rsqrt %16 : vector<32x1xf32>
    %18 = vector.broadcast %17 : vector<32x1xf32> to vector<32x32xf32>
    %19 = arith.mulf %14, %18 : vector<32x32xf32>
    %c0_6 = arith.constant 0 : index
    %c0_7 = arith.constant 0 : index
    %20 = vector.load %arg2[%c0_6, %c0_7] : memref<1x32xf32, #tpu.memory_space<vmem>>, vector<1x32xf32>
    %21 = vector.shape_cast %20 : vector<1x32xf32> to vector<32xf32>
    %22 = vector.shape_cast %21 : vector<32xf32> to vector<1x32xf32>
    %23 = vector.broadcast %22 : vector<1x32xf32> to vector<32x32xf32>
    %24 = arith.mulf %19, %23 : vector<32x32xf32>
    %c0_8 = arith.constant 0 : index
    %c0_9 = arith.constant 0 : index
    %25 = vector.load %arg3[%c0_8, %c0_9] : memref<1x32xf32, #tpu.memory_space<vmem>>, vector<1x32xf32>
    %26 = vector.shape_cast %25 : vector<1x32xf32> to vector<32xf32>
    %27 = vector.shape_cast %26 : vector<32xf32> to vector<1x32xf32>
    %28 = vector.broadcast %27 : vector<1x32xf32> to vector<32x32xf32>
    %29 = arith.addf %24, %28 : vector<32x32xf32>
    %30 = arith.truncf %29 : vector<32x32xf32> to vector<32x32xbf16>
    %c0_10 = arith.constant 0 : index
    %c0_11 = arith.constant 0 : index
    %31 = vector.load %arg4[%c0_10, %c0_11] : memref<32x96xbf16, #tpu.memory_space<vmem>>, vector<32x96xbf16>
    %cst_12 = arith.constant dense<0.000000e+00> : vector<32x96xf32>
    %32 = tpu.matmul %30, %31, %cst_12 {dimension_numbers = #tpu.dot_dimension_numbers<[1], [0], [0], [1], [0, 0, 1, 1], [], []>} : vector<32x32xbf16>, vector<32x96xbf16>, vector<32x96xf32> -> vector<32x96xf32>
    %c0_13 = arith.constant 0 : index
    %c0_14 = arith.constant 0 : index
    %33 = vector.load %arg5[%c0_13, %c0_14] : memref<1x96xf32, #tpu.memory_space<vmem>>, vector<1x96xf32>
    %34 = vector.shape_cast %33 : vector<1x96xf32> to vector<96xf32>
    %35 = vector.shape_cast %34 : vector<96xf32> to vector<1x96xf32>
    %36 = vector.broadcast %35 : vector<1x96xf32> to vector<32x96xf32>
    %37 = arith.addf %32, %36 : vector<32x96xf32>
    %38 = arith.truncf %37 : vector<32x96xf32> to vector<32x96xbf16>
    %39 = vector.extract_strided_slice %38 {offsets = [0, 0], sizes = [32, 32], strides = [1, 1]} : vector<32x96xbf16> to vector<32x32xbf16>
    %40 = vector.shape_cast %39 : vector<32x32xbf16> to vector<2x16x4x8xbf16>
    %41 = tpu.transpose %40, [0, 2, 1, 3] : vector<2x16x4x8xbf16> -> vector<2x4x16x8xbf16>
    %42 = vector.shape_cast %41 : vector<2x4x16x8xbf16> to vector<8x16x8xbf16>
    %43 = vector.extract_strided_slice %38 {offsets = [0, 32], sizes = [32, 32], strides = [1, 1]} : vector<32x96xbf16> to vector<32x32xbf16>
    %44 = vector.shape_cast %43 : vector<32x32xbf16> to vector<2x16x4x8xbf16>
    %45 = tpu.transpose %44, [0, 2, 1, 3] : vector<2x16x4x8xbf16> -> vector<2x4x16x8xbf16>
    %46 = vector.shape_cast %45 : vector<2x4x16x8xbf16> to vector<8x16x8xbf16>
    %47 = vector.extract_strided_slice %38 {offsets = [0, 64], sizes = [32, 32], strides = [1, 1]} : vector<32x96xbf16> to vector<32x32xbf16>
    %48 = vector.shape_cast %47 : vector<32x32xbf16> to vector<2x16x4x8xbf16>
    %49 = tpu.transpose %48, [0, 2, 1, 3] : vector<2x16x4x8xbf16> -> vector<2x4x16x8xbf16>
    %50 = vector.shape_cast %49 : vector<2x4x16x8xbf16> to vector<8x16x8xbf16>
    "tpu.trace_start"() <{level = 10 : i32, message = "hqd,hkd->hqk"}> : () -> ()
    %cst_15 = arith.constant dense<0.000000e+00> : vector<8x16x16xf32>
    %51 = tpu.matmul %42, %46, %cst_15 {dimension_numbers = #tpu.dot_dimension_numbers<[2], [2], [1], [1], [0, 0, 0, 1, 1, 1], [0], [0]>} : vector<8x16x8xbf16>, vector<8x16x8xbf16>, vector<8x16x16xf32> -> vector<8x16x16xf32>
    "tpu.trace_stop"() : () -> ()
    %52 = tpu.iota {dimensions = array<i32: 0>} : vector<16x16xi32>
    %53 = tpu.iota {dimensions = array<i32: 1>} : vector<16x16xi32>
    %54 = arith.cmpi sle, %53, %52 : vector<16x16xi32>
    %55 = vector.shape_cast %54 : vector<16x16xi1> to vector<1x16x16xi1>
    %cst_16 = arith.constant 0xFF800000 : f32
    %56 = vector.shape_cast %55 : vector<1x16x16xi1> to vector<1x16x16xi1>
    %57 = vector.broadcast %56 : vector<1x16x16xi1> to vector<8x16x16xi1>
    %58 = vector.broadcast %cst_16 : f32 to vector<8x16x16xf32>
    %59 = arith.select %57, %51, %58 : vector<8x16x16xi1>, vector<8x16x16xf32>
    %cst_17 = arith.constant dense<0xFF800000> : vector<8x16xf32>
    %60 = vector.multi_reduction <maximumf>, %59, %cst_17 [2] : vector<8x16x16xf32> to vector<8x16xf32>
    %61 = vector.shape_cast %60 : vector<8x16xf32> to vector<8x16x1xf32>
    %62 = vector.broadcast %61 : vector<8x16x1xf32> to vector<8x16x16xf32>
    %63 = arith.subf %59, %62 : vector<8x16x16xf32>
    %64 = math.exp %63 : vector<8x16x16xf32>
    %cst_18 = arith.constant dense<0.000000e+00> : vector<8x16xf32>
    %65 = vector.multi_reduction <add>, %64, %cst_18 [2] : vector<8x16x16xf32> to vector<8x16xf32>
    %66 = vector.shape_cast %65 : vector<8x16xf32> to vector<8x16x1xf32>
    %67 = tpu.reciprocal %66 {approx = true} : vector<8x16x1xf32> -> vector<8x16x1xf32>
    %68 = vector.broadcast %67 : vector<8x16x1xf32> to vector<8x16x16xf32>
    %69 = arith.mulf %64, %68 : vector<8x16x16xf32>
    %70 = arith.truncf %69 : vector<8x16x16xf32> to vector<8x16x16xbf16>
    "tpu.trace_start"() <{level = 10 : i32, message = "hqk,hkd->hqd"}> : () -> ()
    %cst_19 = arith.constant dense<0.000000e+00> : vector<8x16x8xf32>
    %71 = tpu.matmul %70, %50, %cst_19 {dimension_numbers = #tpu.dot_dimension_numbers<[2], [1], [1], [2], [0, 0, 0, 1, 1, 2], [0], [0]>} : vector<8x16x16xbf16>, vector<8x16x8xbf16>, vector<8x16x8xf32> -> vector<8x16x8xf32>
    "tpu.trace_stop"() : () -> ()
    %72 = arith.truncf %71 : vector<8x16x8xf32> to vector<8x16x8xbf16>
    %73 = vector.shape_cast %72 : vector<8x16x8xbf16> to vector<2x4x16x8xbf16>
    %74 = tpu.transpose %73, [0, 2, 1, 3] : vector<2x4x16x8xbf16> -> vector<2x16x4x8xbf16>
    %75 = vector.shape_cast %74 : vector<2x16x4x8xbf16> to vector<32x32xbf16>
    %c0_20 = arith.constant 0 : index
    %c0_21 = arith.constant 0 : index
    %76 = vector.load %arg6[%c0_20, %c0_21] : memref<32x32xbf16, #tpu.memory_space<vmem>>, vector<32x32xbf16>
    %cst_22 = arith.constant dense<0.000000e+00> : vector<32x32xf32>
    %77 = tpu.matmul %75, %76, %cst_22 {dimension_numbers = #tpu.dot_dimension_numbers<[1], [0], [0], [1], [0, 0, 1, 1], [], []>} : vector<32x32xbf16>, vector<32x32xbf16>, vector<32x32xf32> -> vector<32x32xf32>
    %c0_23 = arith.constant 0 : index
    %c0_24 = arith.constant 0 : index
    %78 = vector.load %arg7[%c0_23, %c0_24] : memref<1x32xf32, #tpu.memory_space<vmem>>, vector<1x32xf32>
    %79 = vector.shape_cast %78 : vector<1x32xf32> to vector<32xf32>
    %80 = vector.shape_cast %79 : vector<32xf32> to vector<1x32xf32>
    %81 = vector.broadcast %80 : vector<1x32xf32> to vector<32x32xf32>
    %82 = arith.addf %77, %81 : vector<32x32xf32>
    %83 = arith.addf %82, %1 : vector<32x32xf32>
    %cst_25 = arith.constant dense<0.000000e+00> : vector<32xf32>
    %84 = vector.multi_reduction <add>, %83, %cst_25 [1] : vector<32x32xf32> to vector<32xf32>
    %85 = vector.shape_cast %84 : vector<32xf32> to vector<32x1xf32>
    %cst_26 = arith.constant 3.200000e+01 : f32
    %86 = vector.broadcast %cst_26 : f32 to vector<32x1xf32>
    %87 = arith.divf %85, %86 : vector<32x1xf32>
    %88 = vector.broadcast %87 : vector<32x1xf32> to vector<32x32xf32>
    %89 = arith.subf %83, %88 : vector<32x32xf32>
    %90 = arith.mulf %89, %89 : vector<32x32xf32>
    %cst_27 = arith.constant dense<0.000000e+00> : vector<32xf32>
    %91 = vector.multi_reduction <add>, %90, %cst_27 [1] : vector<32x32xf32> to vector<32xf32>
    %92 = vector.shape_cast %91 : vector<32xf32> to vector<32x1xf32>
    %cst_28 = arith.constant 3.200000e+01 : f32
    %93 = vector.broadcast %cst_28 : f32 to vector<32x1xf32>
    %94 = arith.divf %92, %93 : vector<32x1xf32>
    %95 = vector.broadcast %87 : vector<32x1xf32> to vector<32x32xf32>
    %96 = arith.subf %83, %95 : vector<32x32xf32>
    %cst_29 = arith.constant 9.99999974E-6 : f32
    %97 = vector.broadcast %cst_29 : f32 to vector<32x1xf32>
    %98 = arith.addf %94, %97 : vector<32x1xf32>
    %99 = math.rsqrt %98 : vector<32x1xf32>
    %100 = vector.broadcast %99 : vector<32x1xf32> to vector<32x32xf32>
    %101 = arith.mulf %96, %100 : vector<32x32xf32>
    %c0_30 = arith.constant 0 : index
    %c0_31 = arith.constant 0 : index
    %102 = vector.load %arg8[%c0_30, %c0_31] : memref<1x32xf32, #tpu.memory_space<vmem>>, vector<1x32xf32>
    %103 = vector.shape_cast %102 : vector<1x32xf32> to vector<32xf32>
    %104 = vector.shape_cast %103 : vector<32xf32> to vector<1x32xf32>
    %105 = vector.broadcast %104 : vector<1x32xf32> to vector<32x32xf32>
    %106 = arith.mulf %101, %105 : vector<32x32xf32>
    %c0_32 = arith.constant 0 : index
    %c0_33 = arith.constant 0 : index
    %107 = vector.load %arg9[%c0_32, %c0_33] : memref<1x32xf32, #tpu.memory_space<vmem>>, vector<1x32xf32>
    %108 = vector.shape_cast %107 : vector<1x32xf32> to vector<32xf32>
    %109 = vector.shape_cast %108 : vector<32xf32> to vector<1x32xf32>
    %110 = vector.broadcast %109 : vector<1x32xf32> to vector<32x32xf32>
    %111 = arith.addf %106, %110 : vector<32x32xf32>
    %112 = arith.truncf %111 : vector<32x32xf32> to vector<32x32xbf16>
    %c0_34 = arith.constant 0 : index
    %c0_35 = arith.constant 0 : index
    %113 = vector.load %arg10[%c0_34, %c0_35] : memref<32x128xbf16, #tpu.memory_space<vmem>>, vector<32x128xbf16>
    %cst_36 = arith.constant dense<0.000000e+00> : vector<32x128xf32>
    %114 = tpu.matmul %112, %113, %cst_36 {dimension_numbers = #tpu.dot_dimension_numbers<[1], [0], [0], [1], [0, 0, 1, 1], [], []>} : vector<32x32xbf16>, vector<32x128xbf16>, vector<32x128xf32> -> vector<32x128xf32>
    %c0_37 = arith.constant 0 : index
    %c0_38 = arith.constant 0 : index
    %115 = vector.load %arg11[%c0_37, %c0_38] : memref<1x128xf32, #tpu.memory_space<vmem>>, vector<1x128xf32>
    %116 = vector.shape_cast %115 : vector<1x128xf32> to vector<128xf32>
    %117 = vector.shape_cast %116 : vector<128xf32> to vector<1x128xf32>
    %118 = vector.broadcast %117 : vector<1x128xf32> to vector<32x128xf32>
    %119 = arith.addf %114, %118 : vector<32x128xf32>
    %cst_39 = arith.constant 1.702000e+00 : f32
    %120 = vector.broadcast %cst_39 : f32 to vector<32x128xf32>
    %121 = arith.mulf %120, %119 : vector<32x128xf32>
    %122 = arith.negf %121 : vector<32x128xf32>
    %123 = math.exp %122 : vector<32x128xf32>
    %cst_40 = arith.constant 1.000000e+00 : f32
    %124 = vector.broadcast %cst_40 : f32 to vector<32x128xf32>
    %125 = arith.addf %124, %123 : vector<32x128xf32>
    %126 = arith.divf %124, %125 : vector<32x128xf32>
    %127 = arith.mulf %119, %126 : vector<32x128xf32>
    %128 = arith.truncf %127 : vector<32x128xf32> to vector<32x128xbf16>
    %c0_41 = arith.constant 0 : index
    %c0_42 = arith.constant 0 : index
    %129 = vector.load %arg12[%c0_41, %c0_42] : memref<128x32xbf16, #tpu.memory_space<vmem>>, vector<128x32xbf16>
    %cst_43 = arith.constant dense<0.000000e+00> : vector<32x32xf32>
    %130 = tpu.matmul %128, %129, %cst_43 {dimension_numbers = #tpu.dot_dimension_numbers<[1], [0], [0], [1], [0, 0, 1, 1], [], []>} : vector<32x128xbf16>, vector<128x32xbf16>, vector<32x32xf32> -> vector<32x32xf32>
    %c0_44 = arith.constant 0 : index
    %c0_45 = arith.constant 0 : index
    %131 = vector.load %arg13[%c0_44, %c0_45] : memref<1x32xf32, #tpu.memory_space<vmem>>, vector<1x32xf32>
    %132 = vector.shape_cast %131 : vector<1x32xf32> to vector<32xf32>
    %133 = vector.shape_cast %132 : vector<32xf32> to vector<1x32xf32>
    %134 = vector.broadcast %133 : vector<1x32xf32> to vector<32x32xf32>
    %135 = arith.addf %130, %134 : vector<32x32xf32>
    %136 = arith.addf %135, %83 : vector<32x32xf32>
    %137 = vector.shape_cast %136 : vector<32x32xf32> to vector<2x16x32xf32>
    %c0_46 = arith.constant 0 : index
    %c0_47 = arith.constant 0 : index
    %c0_48 = arith.constant 0 : index
    %138 = vector.load %arg14[%c0_46, %c0_47, %c0_48] : memref<2x16x32xf32, #tpu.memory_space<vmem>>, vector<2x16x32xf32>
    tpu.vector_store %arg14[%c0_46, %c0_47, %c0_48], %137 {strides = array<i32>} : memref<2x16x32xf32, #tpu.memory_space<vmem>>, vector<2x16x32xf32>,
    return
  }
  func.func @transform_0(%arg0: i32) -> (i32, i32, i32) {
    %c0_i32 = arith.constant 0 : i32
    %c0_i32_0 = arith.constant 0 : i32
    %c0_i32_1 = arith.constant 0 : i32
    return %arg0, %c0_i32, %c0_i32_0 : i32, i32, i32
  }
  func.func @transform_1(%arg0: i32) -> (i32, i32) {
    %c0_i32 = arith.constant 0 : i32
    %c0_i32_0 = arith.constant 0 : i32
    %c0_i32_1 = arith.constant 0 : i32
    return %c0_i32, %c0_i32_0 : i32, i32
  }
  func.func @transform_2(%arg0: i32) -> (i32, i32) {
    %c0_i32 = arith.constant 0 : i32
    %c0_i32_0 = arith.constant 0 : i32
    %c0_i32_1 = arith.constant 0 : i32
    return %c0_i32, %c0_i32_0 : i32, i32
  }
  func.func @transform_3(%arg0: i32) -> (i32, i32) {
    %c0_i32 = arith.constant 0 : i32
    %c0_i32_0 = arith.constant 0 : i32
    %c0_i32_1 = arith.constant 0 : i32
    return %c0_i32, %c0_i32_0 : i32, i32
  }
  func.func @transform_4(%arg0: i32) -> (i32, i32) {
    %c0_i32 = arith.constant 0 : i32
    %c0_i32_0 = arith.constant 0 : i32
    %c0_i32_1 = arith.constant 0 : i32
    return %c0_i32, %c0_i32_0 : i32, i32
  }
  func.func @transform_5(%arg0: i32) -> (i32, i32) {
    %c0_i32 = arith.constant 0 : i32
    %c0_i32_0 = arith.constant 0 : i32
    %c0_i32_1 = arith.constant 0 : i32
    return %c0_i32, %c0_i32_0 : i32, i32
  }
  func.func @transform_6(%arg0: i32) -> (i32, i32) {
    %c0_i32 = arith.constant 0 : i32
    %c0_i32_0 = arith.constant 0 : i32
    %c0_i32_1 = arith.constant 0 : i32
    return %c0_i32, %c0_i32_0 : i32, i32
  }
  func.func @transform_7(%arg0: i32) -> (i32, i32) {
    %c0_i32 = arith.constant 0 : i32
    %c0_i32_0 = arith.constant 0 : i32
    %c0_i32_1 = arith.constant 0 : i32
    return %c0_i32, %c0_i32_0 : i32, i32
  }
  func.func @transform_8(%arg0: i32) -> (i32, i32) {
    %c0_i32 = arith.constant 0 : i32
    %c0_i32_0 = arith.constant 0 : i32
    %c0_i32_1 = arith.constant 0 : i32
    return %c0_i32, %c0_i32_0 : i32, i32
  }
  func.func @transform_9(%arg0: i32) -> (i32, i32) {
    %c0_i32 = arith.constant 0 : i32
    %c0_i32_0 = arith.constant 0 : i32
    %c0_i32_1 = arith.constant 0 : i32
    return %c0_i32, %c0_i32_0 : i32, i32
  }
  func.func @transform_10(%arg0: i32) -> (i32, i32) {
    %c0_i32 = arith.constant 0 : i32
    %c0_i32_0 = arith.constant 0 : i32
    %c0_i32_1 = arith.constant 0 : i32
    return %c0_i32, %c0_i32_0 : i32, i32
  }
  func.func @transform_11(%arg0: i32) -> (i32, i32) {
    %c0_i32 = arith.constant 0 : i32
    %c0_i32_0 = arith.constant 0 : i32
    %c0_i32_1 = arith.constant 0 : i32
    return %c0_i32, %c0_i32_0 : i32, i32
  }
  func.func @transform_12(%arg0: i32) -> (i32, i32) {
    %c0_i32 = arith.constant 0 : i32
    %c0_i32_0 = arith.constant 0 : i32
    %c0_i32_1 = arith.constant 0 : i32
    return %c0_i32, %c0_i32_0 : i32, i32
  }
  func.func @transform_13(%arg0: i32) -> (i32, i32, i32) {
    %c0_i32 = arith.constant 0 : i32
    %c0_i32_0 = arith.constant 0 : i32
    %c0_i32_1 = arith.constant 0 : i32
    return %arg0, %c0_i32, %c0_i32_0 : i32, i32, i32
  }
}

</mosaic_0001>

<bundles_post_ra>
// kernel: tpu_custom_call.1
= control target key start
LH: loop header
LB: loop body
LE: loop exit
PB: predicated region body
PF: predicated region fallthrough
CT: control target
= control target key end

     0   :  { %vm50_vm0 = vcmask 261120   ;;  %s5119_s0 = inlined_call_operand.vmem [shape: f32[2,16,32], index: 0, kind: input, shape index: {}]   ;;  %s5120_s1 = inlined_call_operand.vmem [shape: f32[1,32], index: 1, kind: input, shape index: {}]   ;;  %s5121_s2 = inlined_call_operand.vmem [shape: f32[1,32], index: 2, kind: input, shape index: {}]   ;;  %s5122_s3 = inlined_call_operand.vmem [shape: bf16[32,96], index: 3, kind: input, shape index: {}]   ;;  %s5123_s4 = inlined_call_operand.vmem [shape: f32[1,96], index: 4, kind: input, shape index: {}]   ;;  %s5124_s5 = inlined_call_operand.vmem [shape: bf16[32,32], index: 5, kind: input, shape index: {}]   ;;  %s5125_s6 = inlined_call_operand.vmem [shape: f32[1,32], index: 6, kind: input, shape index: {}]   ;;  %s5126_s7 = inlined_call_operand.vmem [shape: f32[1,32], index: 7, kind: input, shape index: {}]   ;;  %s5127_s8 = inlined_call_operand.vmem [shape: f32[1,32], index: 8, kind: input, shape index: {}]   ;;  %s5128_s9 = inlined_call_operand.vmem [shape: bf16[32,128], index: 9, kind: input, shape index: {}]   ;;  %s5129_s10 = inlined_call_operand.vmem [shape: f32[1,128], index: 10, kind: input, shape index: {}]   ;;  %s5130_s11 = inlined_call_operand.vmem [shape: bf16[128,32], index: 11, kind: input, shape index: {}]   ;;  %s5131_s12 = inlined_call_operand.vmem [shape: f32[1,32], index: 12, kind: input, shape index: {}]   ;;  %s5132_s13 = inlined_call_operand.hbm [shape: f32[2,16,32], index: 13, kind: output, shape index: {}]  }
   0x1   :  { %v46_v0 = vld [vmem:[%s5119_s0] sm:$0xff]  ;;  %v48_v1 = vld [vmem:[%s5119_s0 + $0x10] sm:$0xff]  ;;  %v47_v2 = vld [vmem:[%s5119_s0 + $0x8] sm:$0xff] }
   0x2   :  { %v51_v3 = vsel %vm50_vm0, %v46_v0, 0.0  ;;  %v57_v4 = vsel %vm50_vm0, %v48_v1, 0.0  ;;  %v49_v5 = vld [vmem:[%s5119_s0 + $0x18] sm:$0xff]  ;;  %v54_v6 = vsel %vm50_vm0, %v47_v2, 0.0 }
   0x3   :  { %52 = vadd.xlane.f32.xlu0 %v51_v3  ;;  %58 = vadd.xlane.f32.xlu1 %v57_v4  ;;  %v60_v7 = vsel %vm50_vm0, %v49_v5, 0.0 }
   0x7   :  { %55 = vadd.xlane.f32.xlu0 %v54_v6  ;;  %61 = vadd.xlane.f32.xlu1 %v60_v7 }
   0x8   :  { %18 = vsyncpa [#allocation3], 0  ;;  %v4025_v28 = vld [vmem:[%s5122_s3] sm:$0xff]   ;;  %v4026_v29 = vld [vmem:[%s5122_s3 + $0x8] sm:$0xff]   ;;  %s4164_s24 = smov 120   ;;  %s4165_s25 = smov 104  }
   0x9   :  { %3870 = vmatprep.subr.bf16.mxu0 %v4025_v28  ;;  %v3736_v44 = vld [vmem:[%s5120_s1] ss:$0 sm:$0xff]  ;;  %vm4168_vm1 = vmmov 0   ;;  %vm1828_vm2 = vcmask 64512   ;;  %vm2232_vm4 = vcmask 130048   ;;  %s4172_s26 = smov 64  }
   0xa   :  { %3871 = vmatpush3.bf16.msra.mxu0 %v4025_v28  ;;  %v3737_v50 = vld [vmem:[%s5121_s2] ss:$0 sm:$0xff]  ;;  %s4163_s2 = smov 112   ;;  %v4171_v28 = vmov 1934713408   ;;  %s4173_s27 = smov 16  }
   0xb   :  { %3872 = vmatprep.subr.bf16.mxu0 %v4026_v29  ;;  %v3738_v63 = vld [vmem:[%s5123_s4] ss:$0 sm:$0xff]  ;;  %s4166_s4 = smov 96   ;;  %s4174_s28 = smov 8   ;;  %vm3319_vm6 = vcmask 195584  }
   0xc   :  { %s4175_s29 = smov 24  }
   0xe   :  { %3873 = vmatpush3.bf16.msra.mxu0 %v4026_v29  ;;  %v293_v29 = vunpack.c.l.s4 %v4171_v28 }
  0x90   :  { %v53_v8 = vpop.xlane.xlu0 %52  ;;  %v59_v9 = vpop.xlane.xlu1 %58 }
  0x91   :  { %v64_v10 = vmul.f32 0.03125, %v53_v8  ;;  %v66_v11 = vmul.f32 0.03125, %v59_v9 }
  0x93   :  { %v68_v12 = vsub.f32 %v46_v0, %v64_v10  ;;  %v70_v13 = vsub.f32 %v48_v1, %v66_v11 }
  0x94   :  { %v56_v14 = vpop.xlane.xlu0 %55  ;;  %v62_v15 = vpop.xlane.xlu1 %61 }
  0x95   :  { %v65_v16 = vmul.f32 0.03125, %v56_v14  ;;  %v67_v17 = vmul.f32 0.03125, %v62_v15  ;;  %v72_v18 = vmul.f32 %v68_v12, %v68_v12  ;;  %v74_v19 = vmul.f32 %v70_v13, %v70_v13 }
  0x96   :  { %v4167_v15 = vmov 0.0  }
  0x97   :  { %v69_v20 = vsub.f32 %v47_v2, %v65_v16  ;;  %v71_v21 = vsub.f32 %v49_v5, %v67_v17  ;;  %v76_v22 = vsel %vm50_vm0, %v72_v18, 0.0  ;;  %v82_v23 = vsel %vm50_vm0, %v74_v19, 0.0  ;;  %3878 = vmatprep.subr.bf16.mxu0 %v4167_v15  ;;  %3890 = vmatprep.subr.bf16.mxu1 %v4167_v15 }
  0x98   :  { %77 = vadd.xlane.f32.xlu0 %v76_v22  ;;  %3892 = vmatprep.mubr.msk.bf16.mxu1 %vm4168_vm1, %v4167_v15  ;;  %v4169_v16 = vmov 1983009808   ;;  %v264_v18 = vlaneseq }
  0x99   :  { %v73_v24 = vmul.f32 %v69_v20, %v69_v20  ;;  %v75_v25 = vmul.f32 %v71_v21, %v71_v21  ;;  %v262_v17 = vunpack.c.l.s4 %v4169_v16 }
  0x9b   :  { %v79_v26 = vsel %vm50_vm0, %v73_v24, 0.0  ;;  %v85_v27 = vsel %vm50_vm0, %v75_v25, 0.0 }
  0x9c   :  { %83 = vadd.xlane.f32.xlu0 %v82_v23  ;;  %80 = vadd.xlane.f32.xlu1 %v79_v26  ;;  %v4170_v23 = vmov 0  }
  0x9d   :  { %v4327_v24 = vpack.i.b16 %v4170_v23, %v4170_v23 }
  0xa0   :  { %86 = vadd.xlane.f32.xlu1 %v85_v27 }
 0x125   :  { %v78_v30 = vpop.xlane.xlu0 %77 }
 0x126   :  { %v88_v31 = vmul.f32 0.03125, %v78_v30 }
 0x128   :  { %v92_v32 = vadd.f32 1e-05, %v88_v31 }
 0x129   :  { %v81_v33 = vpop.xlane.xlu1 %80  ;;  %v84_v34 = vpop.xlane.xlu0 %83 }
 0x12a   :  { %4039 = vrsqrt.f32 %v92_v32  ;;  %v89_v35 = vmul.f32 0.03125, %v81_v33  ;;  %v90_v36 = vmul.f32 0.03125, %v84_v34 }
 0x12c   :  { %v93_v37 = vadd.f32 1e-05, %v89_v35  ;;  %v94_v38 = vadd.f32 1e-05, %v90_v36  ;;  %v294_v36 = vunpack.c.0.s8 %v293_v29 }
 0x12d   :  { %v87_v39 = vpop.xlane.xlu1 %86 }
 0x12e   :  { %4041 = vrsqrt.f32 %v93_v37  ;;  %v91_v40 = vmul.f32 0.03125, %v87_v39 }
 0x12f   :  { %4043 = vrsqrt.f32 %v94_v38 }
 0x130   :  { %v95_v41 = vadd.f32 1e-05, %v91_v40 }
 0x132   :  { %4045 = vrsqrt.f32 %v95_v41 }
 0x134   :  { %v4040_v42 = vpop.eup %4039 }
 0x135   :  { %v100_v43 = vmul.f32 %v4040_v42, %v68_v12 }
 0x137   :  { %v111_v48 = vmul.f32 %v3736_v44, %v100_v43 }
 0x138   :  { %v4042_v45 = vpop.eup %4041 }
 0x139   :  { %v4044_v46 = vpop.eup %4043  ;;  %v101_v47 = vmul.f32 %v4042_v45, %v69_v20  ;;  %v122_v54 = vadd.f32 %v3737_v50, %v111_v48  ;;  %v263_v20 = vunpack.c.0.s8 %v262_v17 }
 0x13a   :  { %v102_v49 = vmul.f32 %v4044_v46, %v70_v13 }
 0x13b   :  { %v112_v51 = vmul.f32 %v3736_v44, %v101_v47 }
 0x13c   :  { %v4046_v52 = vpop.eup %4045  ;;  %v113_v56 = vmul.f32 %v3736_v44, %v102_v49 }
 0x13d   :  { %v103_v53 = vmul.f32 %v4046_v52, %v71_v21  ;;  %v123_v55 = vadd.f32 %v3737_v50, %v112_v51  ;;  %v4324_v21 = vshrl.u32 %v264_v18, 7 }
 0x13e   :  { %v124_v59 = vadd.f32 %v3737_v50, %v113_v56 }
 0x13f   :  { %v126_v57 = vpack.c.bf16 %v123_v55, %v122_v54  ;;  %v114_v58 = vmul.f32 %v3736_v44, %v103_v53  ;;  %v4336_v32 = vsub.s32 %v263_v20, %v4324_v21  ;;  %v4347_v44 = vsub.s32 %v294_v36, %v4324_v21 }
 0x141   :  { %3874 = vmatprep.mubr.msk.bf16.mxu0 %vm50_vm0, %v126_v57  ;;  %v125_v60 = vadd.f32 %v3737_v50, %v114_v58 }
 0x143   :  { %v127_v61 = vpack.c.bf16 %v125_v60, %v124_v59 }
 0x145   :  { %3875 = vmatmul.mubr.msk.bf16.vlgmr.msra.gmra.mrb[0].mxu0 %vm50_vm0, %v127_v61 }
 0x146   :  { %3880 = vmatprep.mubr.msk.bf16.mxu0 %vm4168_vm1, %v4167_v15 }
 0x218   :  { %v3876_v62 = vpop.f32.mrb[0].mxu0 }
 0x219   :  { %v191_v0 = vpop.f32.mrb[1].mxu0  ;;  %v200_v2 = vadd.f32 %v3876_v62, %v3738_v63 }
 0x21a   :  { %v3877_v1 = vpop.f32.mrb[2].mxu0  ;;  %v192_v5 = vadd.f32 %v3738_v63, %v191_v0 }
 0x21b   :  { %v203_v3 = vadd.f32 %v3877_v1, %v3738_v63  ;;  %v194_v4 = vpop.f32.mrb[3].mxu0 }
 0x21c   :  { %v195_v6 = vadd.f32 %v3738_v63, %v194_v4 }
 0x21d   :  { %v4285_v7 = vpack.c.bf16 %v203_v3, %v200_v2 }
 0x21e   :  { %v4287_v8 = vpack.c.bf16 %v195_v6, %v192_v5 }
 0x21f   :  { %v248_v60 = vshrl.u32 %v4285_v7, 16 }
 0x220   :  { %214 = vrot.lane.b32.xlu1 %v4287_v8, %s4163_s2  ;;  %210 = vrot.lane.b32.xlu0 %v4287_v8, %s4164_s24  ;;  %v226_v30 = vshrl.u32 %v4287_v8, 16 }
 0x224   :  { %218 = vrot.lane.b32.xlu1 %v4287_v8, %s4165_s25  ;;  %216 = vrot.lane.b32.xlu0 %v4285_v7, %s4163_s2 }
 0x228   :  { %212 = vrot.lane.b32.xlu1 %v4285_v7, %s4164_s24  ;;  %748 = vrot.lane.b32.xlu0 %v4287_v8, %s4166_s4 }
 0x22c   :  { %220 = vrot.lane.b32.xlu1 %v4285_v7, %s4165_s25 }
 0x292   :  { %v4296_v9 = vpop.permute.xlu1 %214  ;;  %v4298_v10 = vpop.permute.xlu0 %210 }
 0x293   :  { %756 = vrot.lane.b32.xlu0 %v4296_v9, %s4166_s4  ;;  %752 = vrot.lane.b32.xlu1 %v4298_v10, %s4166_s4  ;;  %v224_v25 = vpack.i.b16 %v4298_v10, %v4287_v8  ;;  %v227_v26 = vshrl.u32 %v4298_v10, 16  ;;  %v234_v27 = vshrl.u32 %v4296_v9, 16 }
 0x295   :  { %v228_v34 = vpack.i.b16 %v227_v26, %v226_v30  ;;  %v260_v35 = vcombine.high %v224_v25, %v4327_v24  ;;  %v267_v39 = vrot.slane %v224_v25, %v4336_v32 }
 0x296   :  { %v4302_v11 = vpop.permute.xlu1 %218  ;;  %v4306_v12 = vpop.permute.xlu0 %216 }
 0x297   :  { %750 = vrot.lane.b32.xlu0 %v4285_v7, %s4166_s4  ;;  %760 = vrot.lane.b32.xlu1 %v4302_v11, %s4166_s4  ;;  %v232_v19 = vpack.i.b16 %v4302_v11, %v4296_v9  ;;  %v235_v22 = vshrl.u32 %v4302_v11, 16  ;;  %v274_v41 = vrot.slane %v260_v35, %v4336_v32  ;;  %v326_v42 = vcombine.high %v228_v34, %v4327_v24 }
 0x298   :  { %v333_v47 = vrot.slane %v228_v34, %v4336_v32  ;;  %v256_v4 = vshrl.u32 %v4306_v12, 16 }
 0x299   :  { %v275_v31 = vcombine.high %v232_v19, %v4327_v24  ;;  %v236_v33 = vpack.i.b16 %v235_v22, %v234_v27  ;;  %v282_v37 = vrot.slane %v232_v19, %v4336_v32  ;;  %v340_v51 = vrot.slane %v326_v42, %v4336_v32 }
 0x29a   :  { %v4308_v13 = vpop.permute.xlu1 %212 }
 0x29b   :  { %758 = vrot.lane.b32.xlu0 %v4306_v12, %s4166_s4  ;;  %754 = vrot.lane.b32.xlu1 %v4308_v13, %s4166_s4  ;;  %v289_v38 = vrot.slane %v275_v31, %v4336_v32  ;;  %v341_v40 = vcombine.high %v236_v33, %v4327_v24  ;;  %v348_v43 = vrot.slane %v236_v33, %v4336_v32  ;;  %v249_v56 = vshrl.u32 %v4308_v13, 16 }
 0x29c   :  { %v290_v45 = vcombine.low %v267_v39, %v282_v37  ;;  %v291_v46 = vcombine.high %v267_v39, %v282_v37  ;;  %v246_v63 = vpack.i.b16 %v4308_v13, %v4285_v7  ;;  %v749_v37 = vpop.permute.xlu0 %748 }
 0x29d   :  { %v306_v48 = vcombine.low %v274_v41, %v289_v38  ;;  %v307_v49 = vcombine.high %v274_v41, %v289_v38  ;;  %v355_v50 = vrot.slane %v341_v40, %v4336_v32  ;;  %v356_v52 = vcombine.low %v333_v47, %v348_v43 }
 0x29e   :  { %v4312_v14 = vpop.permute.xlu1 %220  ;;  %v357_v53 = vcombine.high %v333_v47, %v348_v43  ;;  %v298_v54 = vrot.slane %v290_v45, %v4347_v44  ;;  %v305_v55 = vrot.slane %v291_v46, %v4347_v44  ;;  %v250_v5 = vpack.i.b16 %v249_v56, %v248_v60 }
 0x29f   :  { %762 = vrot.lane.b32.xlu1 %v4312_v14, %s4166_s4  ;;  %v254_v57 = vpack.i.b16 %v4312_v14, %v4306_v12  ;;  %v314_v58 = vrot.slane %v306_v48, %v4347_v44  ;;  %v321_v59 = vrot.slane %v307_v49, %v4347_v44  ;;  %v372_v61 = vcombine.low %v340_v51, %v355_v50 }
 0x2a0   :  { %v373_v62 = vcombine.high %v340_v51, %v355_v50  ;;  %v257_v0 = vshrl.u32 %v4312_v14, 16  ;;  %v364_v1 = vrot.slane %v356_v52, %v4347_v44  ;;  %v371_v2 = vrot.slane %v357_v53, %v4347_v44 }
 0x2a1   :  { %v524_v3 = vcombine.low %v298_v54, %v305_v55  ;;  %v414_v6 = vrot.slane %v254_v57, %v4336_v32  ;;  %v3743_v16 = vcombine.high %v298_v54, %v305_v55  ;;  %v540_v17 = vcombine.low %v314_v58, %v321_v59 }
 0x2a2   :  { %v3744_v19 = vcombine.high %v314_v58, %v321_v59  ;;  %v407_v20 = vcombine.high %v254_v57, %v4327_v24  ;;  %v380_v22 = vrot.slane %v372_v61, %v4347_v44  ;;  %v387_v23 = vrot.slane %v373_v62, %v4347_v44 }
 0x2a3   :  { %v399_v25 = vrot.slane %v246_v63, %v4336_v32  ;;  %v258_v26 = vpack.i.b16 %v257_v0, %v256_v4  ;;  %v574_v27 = vcombine.low %v364_v1, %v371_v2  ;;  %v3745_v28 = vcombine.high %v364_v1, %v371_v2 }
 0x2a4   :  { %v392_v29 = vcombine.high %v246_v63, %v4327_v24  ;;  %v531_v30 = vrot.slane %v524_v3, %v4336_v32  ;;  %v539_v34 = vrot.slane %v3743_v16, %v4336_v32  ;;  %v547_v35 = vrot.slane %v540_v17, %v4336_v32 }
 0x2a5   :  { %v422_v31 = vcombine.low %v399_v25, %v414_v6  ;;  %v423_v33 = vcombine.high %v399_v25, %v414_v6  ;;  %v555_v36 = vrot.slane %v3744_v19, %v4336_v32  ;;  %v421_v38 = vrot.slane %v407_v20, %v4336_v32 }
 0x2a6   :  { %v590_v39 = vcombine.low %v380_v22, %v387_v23  ;;  %v3746_v40 = vcombine.high %v380_v22, %v387_v23  ;;  %v458_v41 = vcombine.high %v250_v5, %v4327_v24  ;;  %v473_v42 = vcombine.high %v258_v26, %v4327_v24 }
 0x2a7   :  { %v581_v43 = vrot.slane %v574_v27, %v4336_v32  ;;  %v589_v45 = vrot.slane %v3745_v28, %v4336_v32  ;;  %v406_v46 = vrot.slane %v392_v29, %v4336_v32  ;;  %v480_v47 = vrot.slane %v258_v26, %v4336_v32 }
 0x2a8   :  { %v768_v48 = vshrl.u32 %v749_v37, 16  ;;  %v430_v49 = vrot.slane %v422_v31, %v4347_v44  ;;  %v437_v50 = vrot.slane %v423_v33, %v4347_v44  ;;  %v556_v51 = vcombine.low %v531_v30, %v539_v34 }
 0x2a9   :  { %v465_v52 = vrot.slane %v250_v5, %v4336_v32  ;;  %v438_v53 = vcombine.low %v406_v46, %v421_v38  ;;  %v439_v54 = vcombine.high %v406_v46, %v421_v38  ;;  %v4387_v55 = vrot.slane %v590_v39, %v4336_v32 }
 0x2aa   :  { %v4390_v56 = vrot.slane %v3746_v40, %v4336_v32  ;;  %v472_v57 = vrot.slane %v458_v41, %v4336_v32  ;;  %v487_v58 = vrot.slane %v473_v42, %v4336_v32  ;;  %v564_v63 = vcombine.low %v547_v35, %v555_v36 }
 0x2ab   :  { %v488_v59 = vcombine.low %v465_v52, %v480_v47  ;;  %v489_v60 = vcombine.high %v465_v52, %v480_v47  ;;  %v606_v0 = vcombine.low %v581_v43, %v589_v45  ;;  %v624_v1 = vcombine.low %v430_v49, %v437_v50 }
 0x2ac   :  { %v3747_v2 = vcombine.high %v430_v49, %v437_v50  ;;  %v4395_v5 = vrot.slane %v438_v53, %v4347_v44  ;;  %v4398_v6 = vrot.slane %v439_v54, %v4347_v44  ;;  %v504_v16 = vcombine.low %v472_v57, %v487_v58 }
 0x2ad   :  { %v505_v17 = vcombine.high %v472_v57, %v487_v58  ;;  %v4401_v20 = vrot.slane %v556_v51, %v4347_v44  ;;  %v4404_v22 = vrot.slane %v488_v59, %v4347_v44  ;;  %v4407_v23 = vrot.slane %v564_v63, %v4347_v44 }
 0x2ae   :  { %v4410_v25 = vrot.slane %v606_v0, %v4347_v44  ;;  %v614_v26 = vcombine.low %v4387_v55, %v4390_v56  ;;  %v4415_v27 = vrot.slane %v489_v60, %v4347_v44  ;;  %v4418_v28 = vrot.slane %v624_v1, %v4336_v32 }
 0x2af   :  { %v4421_v29 = vrot.slane %v3747_v2, %v4336_v32  ;;  %v640_v33 = vcombine.low %v4395_v5, %v4398_v6  ;;  %v4427_v38 = vrot.slane %v504_v16, %v4347_v44  ;;  %v4430_v39 = vrot.slane %v505_v17, %v4347_v44 }
 0x2b0   :  { %v3748_v40 = vcombine.high %v4395_v5, %v4398_v6  ;;  %v674_v47 = vcombine.low %v4404_v22, %v4415_v27 }
 0x2b2   :  { %v681_v55 = vrot.slane %v674_v47, %v4336_v32 }
 0x305   :  { %v753_v61 = vpop.permute.xlu1 %752  ;;  %v757_v62 = vpop.permute.xlu0 %756 }
 0x306   :  { %v766_v3 = vpack.i.b16 %v753_v61, %v749_v37  ;;  %v769_v4 = vshrl.u32 %v753_v61, 16  ;;  %v776_v34 = vshrl.u32 %v757_v62, 16 }
 0x308   :  { %v770_v19 = vpack.i.b16 %v769_v4, %v768_v48  ;;  %v796_v30 = vcombine.high %v766_v3, %v4327_v24  ;;  %v803_v42 = vrot.slane %v766_v3, %v4336_v32 }
 0x309   :  { %v761_v31 = vpop.permute.xlu1 %760  ;;  %v751_v37 = vpop.permute.xlu0 %750 }
 0x30a   :  { %v774_v35 = vpack.i.b16 %v761_v31, %v757_v62  ;;  %v777_v36 = vshrl.u32 %v761_v31, 16  ;;  %v862_v41 = vcombine.high %v770_v19, %v4327_v24  ;;  %v810_v48 = vrot.slane %v796_v30, %v4336_v32 }
 0x30b   :  { %v869_v49 = vrot.slane %v770_v19, %v4336_v32  ;;  %v784_v50 = vshrl.u32 %v751_v37, 16 }
 0x30c   :  { %v778_v43 = vpack.i.b16 %v777_v36, %v776_v34  ;;  %v811_v45 = vcombine.high %v774_v35, %v4327_v24  ;;  %v818_v46 = vrot.slane %v774_v35, %v4336_v32  ;;  %v876_v58 = vrot.slane %v862_v41, %v4336_v32 }
 0x30d   :  { %v755_v51 = vpop.permute.xlu1 %754  ;;  %v759_v34 = vpop.permute.xlu0 %758 }
 0x30e   :  { %v825_v52 = vrot.slane %v811_v45, %v4336_v32  ;;  %v826_v53 = vcombine.low %v803_v42, %v818_v46  ;;  %v827_v54 = vcombine.high %v803_v42, %v818_v46  ;;  %v877_v57 = vcombine.high %v778_v43, %v4327_v24 }
 0x30f   :  { %v884_v59 = vrot.slane %v778_v43, %v4336_v32  ;;  %v782_v60 = vpack.i.b16 %v755_v51, %v751_v37  ;;  %v785_v61 = vshrl.u32 %v755_v51, 16  ;;  %v3749_v42 = vcombine.high %v4404_v22, %v4415_v27 }
 0x310   :  { %v834_v62 = vrot.slane %v826_v53, %v4347_v44  ;;  %v841_v63 = vrot.slane %v827_v54, %v4347_v44  ;;  %v842_v0 = vcombine.low %v810_v48, %v825_v52  ;;  %v843_v1 = vcombine.high %v810_v48, %v825_v52 }
 0x311   :  { %v891_v2 = vrot.slane %v877_v57, %v4336_v32  ;;  %v892_v3 = vcombine.low %v869_v49, %v884_v59  ;;  %v893_v4 = vcombine.high %v869_v49, %v884_v59  ;;  %v786_v16 = vpack.i.b16 %v785_v61, %v784_v50  ;;  %v763_v48 = vpop.permute.xlu1 %762 }
 0x312   :  { %v850_v17 = vrot.slane %v842_v0, %v4347_v44  ;;  %v857_v19 = vrot.slane %v843_v1, %v4347_v44  ;;  %v1060_v30 = vcombine.low %v834_v62, %v841_v63  ;;  %v3751_v31 = vcombine.high %v834_v62, %v841_v63 }
 0x313   :  { %v900_v35 = vrot.slane %v892_v3, %v4347_v44  ;;  %v907_v36 = vrot.slane %v893_v4, %v4347_v44  ;;  %v908_v37 = vcombine.low %v876_v58, %v891_v2  ;;  %v909_v41 = vcombine.high %v876_v58, %v891_v2 }
 0x314   :  { %v690_v43 = vcombine.low %v4427_v38, %v4430_v39  ;;  %v1076_v45 = vcombine.low %v850_v17, %v857_v19  ;;  %v3752_v46 = vcombine.high %v850_v17, %v857_v19  ;;  %v1067_v51 = vrot.slane %v1060_v30, %v4336_v32 }
 0x315   :  { %v916_v49 = vrot.slane %v908_v37, %v4347_v44  ;;  %v923_v50 = vrot.slane %v909_v41, %v4347_v44  ;;  %v792_v52 = vshrl.u32 %v759_v34, 16  ;;  %v1075_v53 = vrot.slane %v3751_v31, %v4336_v32 }
 0x316   :  { %v1110_v54 = vcombine.low %v900_v35, %v907_v36  ;;  %v928_v57 = vcombine.high %v782_v60, %v4327_v24  ;;  %v994_v58 = vcombine.high %v786_v16, %v4327_v24  ;;  %v3753_v59 = vcombine.high %v900_v35, %v907_v36 }
 0x317   :  { %v935_v61 = vrot.slane %v782_v60, %v4336_v32  ;;  %v790_v62 = vpack.i.b16 %v763_v48, %v759_v34  ;;  %v793_v63 = vshrl.u32 %v763_v48, 16  ;;  %v1126_v0 = vcombine.low %v916_v49, %v923_v50 }
 0x318   :  { %v1001_v1 = vrot.slane %v786_v16, %v4336_v32  ;;  %v1083_v2 = vrot.slane %v1076_v45, %v4336_v32  ;;  %v1091_v3 = vrot.slane %v3752_v46, %v4336_v32  ;;  %v3754_v4 = vcombine.high %v916_v49, %v923_v50 }
 0x319   :  { %v794_v17 = vpack.i.b16 %v793_v63, %v792_v52  ;;  %v943_v19 = vcombine.high %v790_v62, %v4327_v24  ;;  %v950_v30 = vrot.slane %v790_v62, %v4336_v32  ;;  %v942_v31 = vrot.slane %v928_v57, %v4336_v32 }
 0x31a   :  { %v1008_v35 = vrot.slane %v994_v58, %v4336_v32  ;;  %v1092_v60 = vcombine.low %v1067_v51, %v1075_v53  ;;  %v1100_v34 = vcombine.low %v1083_v2, %v1091_v3  ;;  %v1117_v46 = vrot.slane %v1110_v54, %v4336_v32 }
 0x31b   :  { %v957_v36 = vrot.slane %v943_v19, %v4336_v32  ;;  %v958_v37 = vcombine.low %v935_v61, %v950_v30  ;;  %v959_v16 = vcombine.high %v935_v61, %v950_v30  ;;  %v1009_v41 = vcombine.high %v794_v17, %v4327_v24 }
 0x31c   :  { %v1016_v45 = vrot.slane %v794_v17, %v4336_v32  ;;  %v1125_v48 = vrot.slane %v3753_v59, %v4336_v32  ;;  %v1133_v49 = vrot.slane %v1126_v0, %v4336_v32  ;;  %v1141_v62 = vrot.slane %v3754_v4, %v4336_v32 }
 0x31d   :  { %v966_v50 = vrot.slane %v958_v37, %v4347_v44  ;;  %v973_v52 = vrot.slane %v959_v16, %v4347_v44  ;;  %v974_v51 = vcombine.low %v942_v31, %v957_v36  ;;  %v975_v53 = vcombine.high %v942_v31, %v957_v36 }
 0x31e   :  { %v1023_v57 = vrot.slane %v1009_v41, %v4336_v32  ;;  %v1024_v58 = vcombine.low %v1001_v1, %v1016_v45  ;;  %v1025_v61 = vcombine.high %v1001_v1, %v1016_v45  ;;  %v1099_v36 = vrot.slane %v1092_v60, %v4347_v44 }
 0x31f   :  { %v982_v63 = vrot.slane %v974_v51, %v4347_v44  ;;  %v989_v54 = vrot.slane %v975_v53, %v4347_v44  ;;  %v1160_v2 = vcombine.low %v966_v50, %v973_v52  ;;  %v3755_v59 = vcombine.high %v966_v50, %v973_v52 }
 0x320   :  { %v1032_v0 = vrot.slane %v1024_v58, %v4347_v44  ;;  %v1039_v3 = vrot.slane %v1025_v61, %v4347_v44  ;;  %v1040_v17 = vcombine.low %v1008_v35, %v1023_v57  ;;  %v1041_v19 = vcombine.high %v1008_v35, %v1023_v57 }
 0x321   :  { %v1176_v30 = vcombine.low %v982_v63, %v989_v54  ;;  %v3756_v31 = vcombine.high %v982_v63, %v989_v54  ;;  %v1107_v1 = vrot.slane %v1100_v34, %v4347_v44  ;;  %v1167_v45 = vrot.slane %v1160_v2, %v4336_v32 }
 0x322   :  { %v1048_v4 = vrot.slane %v1040_v17, %v4347_v44  ;;  %v1055_v37 = vrot.slane %v1041_v19, %v4347_v44  ;;  %v1210_v16 = vcombine.low %v1032_v0, %v1039_v3  ;;  %v3757_v41 = vcombine.high %v1032_v0, %v1039_v3 }
 0x323   :  { %v1175_v50 = vrot.slane %v3755_v59, %v4336_v32  ;;  %v1142_v52 = vcombine.low %v1117_v46, %v1125_v48  ;;  %v1150_v51 = vcombine.low %v1133_v49, %v1141_v62  ;;  %v1183_v57 = vrot.slane %v1176_v30, %v4336_v32 }
 0x324   :  { %v1226_v35 = vcombine.low %v1048_v4, %v1055_v37  ;;  %v3758_v53 = vcombine.high %v1048_v4, %v1055_v37  ;;  %v1191_v60 = vrot.slane %v3756_v31, %v4336_v32  ;;  %v3750_v34 = vcombine.high %v4427_v38, %v4430_v39 }
 0x325   :  { %v1108_v58 = vcombine.low %v1099_v36, %v1107_v1  ;;  %v1149_v61 = vrot.slane %v1142_v52, %v4347_v44  ;;  %v1157_v63 = vrot.slane %v1150_v51, %v4347_v44  ;;  %v1217_v2 = vrot.slane %v1210_v16, %v4336_v32 }
 0x326   :  { %v1200_v54 = vcombine.low %v1183_v57, %v1191_v60  ;;  %v1225_v46 = vrot.slane %v3757_v41, %v4336_v32  ;;  %v1233_v48 = vrot.slane %v1226_v35, %v4336_v32  ;;  %v4500_v62 = vcombine.high %v1099_v36, %v1107_v1 }
 0x327   :  { %v1158_v49 = vcombine.low %v1149_v61, %v1157_v63  ;;  %v4502_v59 = vcombine.high %v1149_v61, %v1157_v63  ;;  %v1241_v0 = vrot.slane %v3758_v53, %v4336_v32  ;;  %v647_v3 = vrot.slane %v640_v33, %v4336_v32 }
 0x328   :  { %v621_v17 = vrot.slane %v614_v26, %v4347_v44  ;;  %v1192_v19 = vcombine.low %v1167_v45, %v1175_v50  ;;  %v1242_v30 = vcombine.low %v1217_v2, %v1225_v46  ;;  %v697_v31 = vrot.slane %v690_v43, %v4336_v32 }
 0x329   :  { %v705_v36 = vrot.slane %v3750_v34, %v4336_v32  ;;  %v1262_v1 = vpack.i.b16 %v1158_v49, %v1108_v58  ;;  %v1268_v4 = vpack.i.b16 %v4502_v59, %v4500_v62  ;;  %v655_v33 = vrot.slane %v3748_v40, %v4336_v32 }
 0x32a   :  { %v1207_v56 = vrot.slane %v1200_v54, %v4347_v44  ;;  %v1250_v26 = vcombine.low %v1233_v48, %v1241_v0  ;;  %v689_v38 = vrot.slane %v3749_v42, %v4336_v32  ;;  %v1264_v37 = vshrl.u32 %v1158_v49, 16 }
 0x32b   :  { %v1833_v39 = vsel %vm1828_vm2, %v1262_v1, 0  ;;  %v1927_v43 = vsel %vm1828_vm2, %v1268_v4, 0  ;;  %v1199_v5 = vrot.slane %v1192_v19, %v4347_v44  ;;  %v1249_v6 = vrot.slane %v1242_v30, %v4347_v44 }
 0x32c   :  { %3879 = vmatpush3.bf16.xpose.msra.mxu0 %v1833_v39  ;;  %3891 = vmatpush3.bf16.xpose.msra.mxu1 %v1927_v43  ;;  %v1257_v40 = vrot.slane %v1250_v26, %v4347_v44  ;;  %v622_v47 = vcombine.low %v4410_v25, %v621_v17  ;;  %v623_v22 = vcombine.high %v4410_v25, %v621_v17  ;;  %v1263_v27 = vshrl.u32 %v1108_v58, 16 }
 0x32d   :  { %3884 = vmatprep.subr.bf16.mxu0 %v4167_v15  ;;  %3902 = vmatprep.subr.bf16.mxu1 %v4167_v15  ;;  %v714_v42 = vcombine.low %v697_v31, %v705_v36  ;;  %v1208_v16 = vcombine.low %v1199_v5, %v1207_v56  ;;  %v664_v45 = vcombine.low %v647_v3, %v655_v33  ;;  %v1270_v63 = vshrl.u32 %v4502_v59, 16 }
 0x32e   :  { %v1258_v41 = vcombine.low %v1249_v6, %v1257_v40  ;;  %v572_v50 = vcombine.low %v4401_v20, %v4407_v23  ;;  %v573_v52 = vcombine.high %v4401_v20, %v4407_v23  ;;  %v1265_v51 = vpack.i.b16 %v1264_v37, %v1263_v27 }
 0x32f   :  { %v706_v35 = vcombine.low %v681_v55, %v689_v38  ;;  %v656_v53 = vcombine.low %v4418_v28, %v4421_v29  ;;  %v721_v34 = vrot.slane %v714_v42, %v4347_v44  ;;  %v671_v61 = vrot.slane %v664_v45, %v4347_v44 }
 0x330   :  { %v1274_v57 = vpack.i.b16 %v1258_v41, %v1208_v16  ;;  %v726_v25 = vpack.i.b16 %v622_v47, %v572_v50  ;;  %v732_v60 = vpack.i.b16 %v623_v22, %v573_v52  ;;  %v1880_v20 = vsel %vm1828_vm2, %v1265_v51, 0 }
 0x331   :  { %v713_v23 = vrot.slane %v706_v35, %v4347_v44  ;;  %v1259_v28 = vcombine.high %v1249_v6, %v1257_v40  ;;  %v663_v29 = vrot.slane %v656_v53, %v4347_v44  ;;  %v1269_v54 = vshrl.u32 %v4500_v62, 16 }
 0x332   :  { %v2021_v58 = vsel %vm1828_vm2, %v1274_v57, 0  ;;  %v728_v2 = vshrl.u32 %v622_v47, 16  ;;  %v1209_v48 = vcombine.high %v1199_v5, %v1207_v56  ;;  %v727_v49 = vshrl.u32 %v572_v50, 16 }
 0x333   :  { %3881 = vmatmul.mubr.msk.bf16.vlgmr.msra.gmra.mrb[4].mxu0 %vm1828_vm2, %v726_v25  ;;  %3893 = vmatmul.mubr.msk.bf16.vlgmr.msra.gmra.mrb[0].mxu1 %vm1828_vm2, %v732_v60  ;;  %v722_v46 = vcombine.low %v713_v23, %v721_v34  ;;  %v672_v59 = vcombine.low %v663_v29, %v671_v61  ;;  %v1271_v0 = vpack.i.b16 %v1270_v63, %v1269_v54  ;;  %v1276_v31 = vshrl.u32 %v1258_v41, 16 }
 0x334   :  { %3885 = vmatpush3.bf16.xpose.msra.mxu0 %v1880_v20  ;;  %3903 = vmatpush3.bf16.xpose.msra.mxu1 %v2021_v58  ;;  %v1280_v3 = vpack.i.b16 %v1259_v28, %v1209_v48  ;;  %v729_v17 = vpack.i.b16 %v728_v2, %v727_v49  ;;  %v734_v36 = vshrl.u32 %v623_v22, 16  ;;  %v723_v1 = vcombine.high %v713_v23, %v721_v34 }
 0x335   :  { %3886 = vmatprep.mubr.msk.bf16.mxu0 %vm4168_vm1, %v4167_v15  ;;  %3904 = vmatprep.mubr.msk.bf16.mxu1 %vm4168_vm1, %v4167_v15  ;;  %v738_v19 = vpack.i.b16 %v722_v46, %v672_v59  ;;  %v1974_v62 = vsel %vm1828_vm2, %v1271_v0, 0  ;;  %v1275_v4 = vshrl.u32 %v1208_v16, 16  ;;  %v733_v33 = vshrl.u32 %v573_v52, 16 }
 0x336   :  { %3896 = vmatprep.subr.bf16.mxu0 %v4167_v15  ;;  %3914 = vmatprep.subr.bf16.mxu1 %v4167_v15  ;;  %v2115_v30 = vsel %vm1828_vm2, %v1280_v3, 0  ;;  %v673_v55 = vcombine.high %v663_v29, %v671_v61  ;;  %v1282_v43 = vshrl.u32 %v1259_v28, 16  ;;  %v740_v37 = vshrl.u32 %v722_v46, 16 }
 0x337   :  { %v1277_v56 = vpack.i.b16 %v1276_v31, %v1275_v4  ;;  %v735_v26 = vpack.i.b16 %v734_v36, %v733_v33  ;;  %v1281_v5 = vshrl.u32 %v1209_v48, 16  ;;  %v739_v6 = vshrl.u32 %v672_v59, 16 }
 0x338   :  { %v744_v38 = vpack.i.b16 %v723_v1, %v673_v55  ;;  %v746_v27 = vshrl.u32 %v723_v1, 16  ;;  %v745_v42 = vshrl.u32 %v673_v55, 16  ;;  %v2209_v41 = vand.u32 127, %v264_v18 }
 0x339   :  { %v2068_v39 = vsel %vm1828_vm2, %v1277_v56, 0  ;;  %v1283_v40 = vpack.i.b16 %v1282_v43, %v1281_v5  ;;  %v741_v47 = vpack.i.b16 %v740_v37, %v739_v6  ;;  %v2207_v45 = vadd.s32 8, %v4324_v21 }
 0x33a   :  { %v747_v16 = vpack.i.b16 %v746_v27, %v745_v42  ;;  %vm4593_vm3 = vcmp.le.s32.totalorder %v2209_v41, %v4324_v21 }
 0x33b   :  { %3887 = vmatmul.mubr.msk.bf16.vlgmr.msra.gmra.mrb[8].mxu0 %vm1828_vm2, %v729_v17  ;;  %3905 = vmatmul.mubr.msk.bf16.vlgmr.msra.gmra.mrb[4].mxu1 %vm1828_vm2, %v738_v19  ;;  %v2162_v22 = vsel %vm1828_vm2, %v1283_v40, 0  ;;  %vm4597_vm5 = vcmp.le.s32.totalorder %v2209_v41, %v2207_v45 }
 0x33c   :  { %3897 = vmatpush3.bf16.xpose.msra.mxu0 %v1974_v62  ;;  %3915 = vmatpush3.bf16.xpose.msra.mxu1 %v2115_v30 }
 0x33d   :  { %3898 = vmatprep.mubr.msk.bf16.mxu0 %vm4168_vm1, %v4167_v15  ;;  %3916 = vmatprep.mubr.msk.bf16.mxu1 %vm4168_vm1, %v4167_v15 }
 0x33e   :  { %3908 = vmatprep.subr.bf16.mxu0 %v4167_v15  ;;  %3926 = vmatprep.subr.bf16.mxu1 %v4167_v15 }
 0x343   :  { %3899 = vmatmul.mubr.msk.bf16.vlgmr.msra.gmra.mrb[12].mxu0 %vm1828_vm2, %v735_v26  ;;  %3917 = vmatmul.mubr.msk.bf16.vlgmr.msra.gmra.mrb[8].mxu1 %vm1828_vm2, %v744_v38 }
 0x344   :  { %3909 = vmatpush3.bf16.xpose.msra.mxu0 %v2068_v39  ;;  %3910 = vmatprep.mubr.msk.bf16.mxu0 %vm4168_vm1, %v4167_v15 }
 0x345   :  { %3920 = vmatprep.subr.bf16.mxu0 %v4167_v15  ;;  %3928 = vmatprep.mubr.msk.bf16.mxu1 %vm4168_vm1, %v4167_v15 }
 0x34b   :  { %3911 = vmatmul.mubr.msk.bf16.vlgmr.msra.gmra.mrb[16].mxu0 %vm1828_vm2, %v741_v47 }
 0x34c   :  { %3921 = vmatpush3.bf16.xpose.msra.mxu0 %v2162_v22  ;;  %3922 = vmatprep.mubr.msk.bf16.mxu0 %vm4168_vm1, %v4167_v15 }
 0x34d   :  { %3932 = vmatprep.subr.bf16.mxu0 %v4167_v15 }
 0x353   :  { %3923 = vmatmul.mubr.msk.bf16.vlgmr.msra.gmra.mrb[20].mxu0 %vm1828_vm2, %v747_v16 }
 0x354   :  { %3934 = vmatprep.mubr.msk.bf16.mxu0 %vm4168_vm1, %v4167_v15 }
 0x406   :  { %v1869_v52 = vpop.f32.mrb[4].mxu0  ;;  %v1963_v51 = vpop.f32.mrb[0].mxu1 }
 0x407   :  { %v4603_v53 = vsel %vm4593_vm3, %v1869_v52, -inf  ;;  %v3882_v57 = vpop.f32.mrb[5].mxu0  ;;  %v3894_v18 = vpop.f32.mrb[1].mxu1  ;;  %v4609_v34 = vsel %vm4593_vm3, %v1963_v51, -inf }
 0x408   :  { %v1872_v25 = vpop.f32.mrb[6].mxu0  ;;  %v1966_v60 = vpop.f32.mrb[2].mxu1  ;;  %v2233_v21 = vsel %vm2232_vm4, %v4603_v53, -inf  ;;  %v2245_v28 = vsel %vm2232_vm4, %v4609_v34, -inf }
 0x409   :  { %v4613_v58 = vsel %vm4597_vm5, %v1872_v25, -inf  ;;  %v3895_v61 = vpop.f32.mrb[3].mxu1  ;;  %2234 = vmax.xlane.f32.xlu0 %v2233_v21  ;;  %v3883_v63 = vpop.f32.mrb[7].mxu0  ;;  %v4619_v23 = vsel %vm4597_vm5, %v1966_v60, -inf }
 0x40a   :  { %v2236_v20 = vsel %vm2232_vm4, %v4613_v58, -inf  ;;  %v2248_v2 = vsel %vm2232_vm4, %v4619_v23, -inf }
 0x40b   :  { %2237 = vmax.xlane.f32.xlu1 %v2236_v20 }
 0x40d   :  { %2246 = vmax.xlane.f32.xlu0 %v2245_v28 }
 0x40e   :  { %v1916_v29 = vpop.f32.mrb[8].mxu0  ;;  %v2057_v54 = vpop.f32.mrb[4].mxu1 }
 0x40f   :  { %v4627_v46 = vsel %vm4593_vm3, %v1916_v29, -inf  ;;  %v3906_v48 = vpop.f32.mrb[5].mxu1  ;;  %2249 = vmax.xlane.f32.xlu1 %v2248_v2  ;;  %v3888_v49 = vpop.f32.mrb[9].mxu0  ;;  %v4633_v17 = vsel %vm4593_vm3, %v2057_v54, -inf }
 0x410   :  { %v1919_v59 = vpop.f32.mrb[10].mxu0  ;;  %v2060_v0 = vpop.f32.mrb[6].mxu1  ;;  %v2239_v3 = vsel %vm2232_vm4, %v4627_v46, -inf  ;;  %v2257_v36 = vsel %vm2232_vm4, %v4633_v17, -inf }
 0x411   :  { %v4637_v19 = vsel %vm4597_vm5, %v2060_v0, -inf  ;;  %v3907_v62 = vpop.f32.mrb[7].mxu1  ;;  %2240 = vmax.xlane.f32.xlu0 %v2239_v3  ;;  %v3889_v30 = vpop.f32.mrb[11].mxu0  ;;  %v4645_v1 = vsel %vm4597_vm5, %v1919_v59, -inf }
 0x412   :  { %v2260_v31 = vsel %vm2232_vm4, %v4637_v19, -inf  ;;  %v2242_v39 = vsel %vm2232_vm4, %v4645_v1, -inf }
 0x413   :  { %2261 = vmax.xlane.f32.xlu1 %v2260_v31 }
 0x415   :  { %2258 = vmax.xlane.f32.xlu0 %v2257_v36 }
 0x416   :  { %v2010_v4 = vpop.f32.mrb[12].mxu0  ;;  %v2151_v33 = vpop.f32.mrb[8].mxu1 }
 0x417   :  { %v3900_v55 = vpop.f32.mrb[13].mxu0  ;;  %v3918_v56 = vpop.f32.mrb[9].mxu1  ;;  %v4651_v43 = vsel %vm4593_vm3, %v2010_v4, -inf  ;;  %v4667_v27 = vsel %vm4593_vm3, %v2151_v33, -inf }
 0x418   :  { %v2013_v26 = vpop.f32.mrb[14].mxu0  ;;  %v2154_v38 = vpop.f32.mrb[10].mxu1  ;;  %v2251_v22 = vsel %vm2232_vm4, %v4651_v43, -inf  ;;  %v2269_v52 = vsel %vm2232_vm4, %v4667_v27, -inf }
 0x419   :  { %v4655_v37 = vsel %vm4597_vm5, %v2013_v26, -inf  ;;  %v3919_v5 = vpop.f32.mrb[11].mxu1  ;;  %2243 = vmax.xlane.f32.xlu0 %v2242_v39  ;;  %v3901_v6 = vpop.f32.mrb[15].mxu0  ;;  %v4661_v47 = vsel %vm4597_vm5, %v2154_v38, -inf }
 0x41a   :  { %v2254_v40 = vsel %vm2232_vm4, %v4655_v37, -inf  ;;  %v2272_v16 = vsel %vm2232_vm4, %v4661_v47, -inf }
 0x41b   :  { %2255 = vmax.xlane.f32.xlu1 %v2254_v40 }
 0x41d   :  { %2252 = vmax.xlane.f32.xlu0 %v2251_v22 }
 0x41e   :  { %v2104_v42 = vpop.f32.mrb[16].mxu0 }
 0x41f   :  { %2273 = vmax.xlane.f32.xlu1 %v2272_v16  ;;  %v3912_v41 = vpop.f32.mrb[17].mxu0  ;;  %v4675_v51 = vsel %vm4593_vm3, %v2104_v42, -inf }
 0x420   :  { %v2107_v45 = vpop.f32.mrb[18].mxu0  ;;  %v2263_v25 = vsel %vm2232_vm4, %v4675_v51, -inf }
 0x421   :  { %v4679_v57 = vsel %vm4597_vm5, %v2107_v45, -inf  ;;  %2270 = vmax.xlane.f32.xlu0 %v2269_v52  ;;  %v3913_v18 = vpop.f32.mrb[19].mxu0 }
 0x422   :  { %v2266_v35 = vsel %vm2232_vm4, %v4679_v57, -inf }
 0x425   :  { %2264 = vmax.xlane.f32.xlu0 %v2263_v25 }
 0x426   :  { %v2198_v60 = vpop.f32.mrb[20].mxu0 }
 0x427   :  { %v4685_v21 = vsel %vm4593_vm3, %v2198_v60, -inf  ;;  %v3924_v61 = vpop.f32.mrb[21].mxu0 }
 0x428   :  { %v2201_v63 = vpop.f32.mrb[22].mxu0  ;;  %v2275_v50 = vsel %vm2232_vm4, %v4685_v21, -inf }
 0x429   :  { %v4689_v20 = vsel %vm4597_vm5, %v2201_v63, -inf  ;;  %v3925_v28 = vpop.f32.mrb[23].mxu0 }
 0x430   :  { %1288 = vrot.lane.b32.xlu1 %v4298_v10, %s4172_s26 }
 0x434   :  { %1292 = vrot.lane.b32.xlu1 %v4296_v9, %s4172_s26  ;;  %v2278_v9 = vsel %vm2232_vm4, %v4689_v20, -inf }
 0x438   :  { %1296 = vrot.lane.b32.xlu1 %v4302_v11, %s4172_s26 }
 0x43b   :  { %1284 = vrot.lane.b32.xlu0 %v4287_v8, %s4172_s26 }
 0x45a   :  { %2276 = vmax.xlane.f32.xlu0 %v2275_v50 }
 0x45c   :  { %2267 = vmax.xlane.f32.xlu1 %v2266_v35 }
 0x46d   :  { %1290 = vrot.lane.b32.xlu1 %v4308_v13, %s4172_s26 }
 0x470   :  { %1286 = vrot.lane.b32.xlu0 %v4285_v7, %s4172_s26 }
 0x491   :  { %2279 = vmax.xlane.f32.xlu1 %v2278_v9 }
 0x496   :  { %v2235_v10 = vpop.xlane.xlu0 %2234 }
 0x497   :  { %v2281_v8 = vsub.f32 %v4603_v53, %v2235_v10 }
 0x498   :  { %v2238_v11 = vpop.xlane.xlu1 %2237 }
 0x499   :  { %v2297_v29 = vmul.f32 1.442695, %v2281_v8  ;;  %v2282_v56 = vsub.f32 %v4613_v58, %v2238_v11 }
 0x49a   :  { %v2247_v54 = vpop.xlane.xlu0 %2246 }
 0x49b   :  { %4047 = vpow2.f32 %v2297_v29  ;;  %v2285_v2 = vsub.f32 %v4609_v34, %v2247_v54  ;;  %v2299_v6 = vmul.f32 1.442695, %v2282_v56 }
 0x49c   :  { %v2250_v49 = vpop.xlane.xlu1 %2249 }
 0x49d   :  { %v2305_v48 = vmul.f32 1.442695, %v2285_v2  ;;  %v2286_v58 = vsub.f32 %v4619_v23, %v2250_v49 }
 0x49e   :  { %v2241_v59 = vpop.xlane.xlu0 %2240 }
 0x49f   :  { %4049 = vpow2.f32 %v2305_v48  ;;  %v2283_v13 = vsub.f32 %v4627_v46, %v2241_v59  ;;  %v2307_v63 = vmul.f32 1.442695, %v2286_v58 }
 0x4a0   :  { %v4714_v3 = vpop.xlane.xlu1 %2261 }
 0x4a1   :  { %v2301_v7 = vmul.f32 1.442695, %v2283_v13 }
 0x4a2   :  { %v2259_v0 = vpop.xlane.xlu0 %2258  ;;  %1294 = vrot.lane.b32.xlu1 %v4306_v12, %s4172_s26 }
 0x4a3   :  { %4051 = vpow2.f32 %v2301_v7  ;;  %v2289_v31 = vsub.f32 %v4633_v17, %v2259_v0 }
 0x4a5   :  { %v4716_v53 = vpop.eup %4047  ;;  %v2313_v26 = vmul.f32 1.442695, %v2289_v31 }
 0x4a6   :  { %v2244_v62 = vpop.xlane.xlu0 %2243  ;;  %v2329_v34 = vsel %vm2232_vm4, %v4716_v53, 0.0 }
 0x4a7   :  { %v2284_v30 = vsub.f32 %v4645_v1, %v2244_v62  ;;  %2330 = vadd.xlane.f32.xlu0 %v2329_v34 }
 0x4a8   :  { %v2256_v46 = vpop.xlane.xlu1 %2255 }
 0x4a9   :  { %v4722_v36 = vpop.eup %4049  ;;  %v2303_v4 = vmul.f32 1.442695, %v2284_v30  ;;  %v2288_v45 = vsub.f32 %v4655_v37, %v2256_v46 }
 0x4aa   :  { %v2253_v33 = vpop.xlane.xlu0 %2252  ;;  %v2341_v12 = vsel %vm2232_vm4, %v4722_v36, 0.0 }
 0x4ab   :  { %4053 = vpow2.f32 %v2303_v4  ;;  %v2287_v55 = vsub.f32 %v4651_v43, %v2253_v33  ;;  %2342 = vadd.xlane.f32.xlu0 %v2341_v12  ;;  %v2311_v11 = vmul.f32 1.442695, %v2288_v45 }
 0x4ac   :  { %v4728_v38 = vpop.xlane.xlu1 %2273 }
 0x4ad   :  { %v4730_v1 = vpop.eup %4051  ;;  %v2309_v17 = vmul.f32 1.442695, %v2287_v55 }
 0x4ae   :  { %v4732_v39 = vpop.xlane.xlu0 %2270  ;;  %v2335_v5 = vsel %vm2232_vm4, %v4730_v1, 0.0 }
 0x4af   :  { %4055 = vpow2.f32 %v2309_v17  ;;  %2336 = vadd.xlane.f32.xlu0 %v2335_v5 }
 0x4b0   :  { %4057 = vpow2.f32 %v2313_v26  ;;  %v1289_v40 = vpop.permute.xlu1 %1288 }
 0x4b1   :  { %4059 = vpow2.f32 %v2299_v6  ;;  %v1305_v25 = vshrl.u32 %v1289_v40, 16 }
 0x4b2   :  { %v2265_v43 = vpop.xlane.xlu0 %2264 }
 0x4b3   :  { %v2291_v22 = vsub.f32 %v4675_v51, %v2265_v43 }
 0x4b4   :  { %v1293_v42 = vpop.permute.xlu1 %1292 }
 0x4b5   :  { %v4738_v16 = vpop.eup %4053  ;;  %v2317_v41 = vmul.f32 1.442695, %v2291_v22  ;;  %v1312_v37 = vshrl.u32 %v1293_v42, 16 }
 0x4b6   :  { %v1285_v52 = vpop.permute.xlu0 %1284  ;;  %v2338_v18 = vsel %vm2232_vm4, %v4738_v16, 0.0 }
 0x4b7   :  { %4061 = vpow2.f32 %v2317_v41  ;;  %v1302_v60 = vpack.i.b16 %v1289_v40, %v1285_v52  ;;  %v1304_v61 = vshrl.u32 %v1285_v52, 16  ;;  %2339 = vadd.xlane.f32.xlu0 %v2338_v18 }
 0x4b8   :  { %v1297_v51 = vpop.permute.xlu1 %1296  ;;  %4063 = vpow2.f32 %v2307_v63 }
 0x4b9   :  { %v4743_v28 = vpop.eup %4055  ;;  %v1306_v23 = vpack.i.b16 %v1305_v25, %v1304_v61  ;;  %v1332_v50 = vcombine.high %v1302_v60, %v4327_v24  ;;  %v1310_v35 = vpack.i.b16 %v1297_v51, %v1293_v42  ;;  %v1313_v10 = vshrl.u32 %v1297_v51, 16 }
 0x4ba   :  { %v4746_v9 = vpop.eup %4057  ;;  %v2347_v8 = vsel %vm2232_vm4, %v4743_v28, 0.0  ;;  %v1339_v2 = vrot.slane %v1302_v60, %v4336_v32  ;;  %4065 = vpow2.f32 %v2311_v11 }
 0x4bb   :  { %v1398_v29 = vcombine.high %v1306_v23, %v4327_v24  ;;  %v1347_v54 = vcombine.high %v1310_v35, %v4327_v24  ;;  %2348 = vadd.xlane.f32.xlu0 %v2347_v8  ;;  %v1314_v48 = vpack.i.b16 %v1313_v10, %v1312_v37  ;;  %v1354_v49 = vrot.slane %v1310_v35, %v4336_v32  ;;  %v4759_v62 = vpop.eup %4059 }
 0x4bc   :  { %v1346_v59 = vrot.slane %v1332_v50, %v4336_v32  ;;  %v1405_v13 = vrot.slane %v1306_v23, %v4336_v32  ;;  %v2353_v0 = vsel %vm2232_vm4, %v4746_v9, 0.0  ;;  %v2332_v22 = vsel %vm2232_vm4, %v4759_v62, 0.0 }
 0x4bd   :  { %v1361_v7 = vrot.slane %v1347_v54, %v4336_v32  ;;  %v1362_v34 = vcombine.low %v1339_v2, %v1354_v49  ;;  %v1363_v30 = vcombine.high %v1339_v2, %v1354_v49  ;;  %v1413_v31 = vcombine.high %v1314_v48, %v4327_v24 }
 0x4be   :  { %v1420_v46 = vrot.slane %v1314_v48, %v4336_v32  ;;  %v1412_v4 = vrot.slane %v1398_v29, %v4336_v32 }
 0x4bf   :  { %v1378_v33 = vcombine.low %v1346_v59, %v1361_v7  ;;  %v1379_v12 = vcombine.high %v1346_v59, %v1361_v7  ;;  %2354 = vadd.xlane.f32.xlu0 %v2353_v0  ;;  %v1370_v55 = vrot.slane %v1362_v34, %v4347_v44  ;;  %v1377_v56 = vrot.slane %v1363_v30, %v4347_v44 }
 0x4c0   :  { %v1427_v26 = vrot.slane %v1413_v31, %v4336_v32  ;;  %v1428_v17 = vcombine.low %v1405_v13, %v1420_v46  ;;  %v1429_v43 = vcombine.high %v1405_v13, %v1420_v46 }
 0x4c1   :  { %v4767_v5 = vpop.eup %4061  ;;  %v1386_v6 = vrot.slane %v1378_v33, %v4347_v44  ;;  %v1393_v40 = vrot.slane %v1379_v12, %v4347_v44  ;;  %v1596_v45 = vcombine.low %v1370_v55, %v1377_v56  ;;  %v3759_v18 = vcombine.high %v1370_v55, %v1377_v56 }
 0x4c2   :  { %v1436_v58 = vrot.slane %v1428_v17, %v4347_v44  ;;  %v1444_v42 = vcombine.low %v1412_v4, %v1427_v26  ;;  %v1445_v41 = vcombine.high %v1412_v4, %v1427_v26  ;;  %v1443_v52 = vrot.slane %v1429_v43, %v4347_v44  ;;  %v4783_v8 = vpop.eup %4063 }
 0x4c3   :  { %v1612_v25 = vcombine.low %v1386_v6, %v1393_v40  ;;  %v3760_v60 = vcombine.high %v1386_v6, %v1393_v40  ;;  %v1603_v51 = vrot.slane %v1596_v45, %v4336_v32  ;;  %v2359_v23 = vsel %vm2232_vm4, %v4767_v5, 0.0 }
 0x4c4   :  { %v1452_v61 = vrot.slane %v1444_v42, %v4347_v44  ;;  %v1459_v63 = vrot.slane %v1445_v41, %v4347_v44  ;;  %v1611_v50 = vrot.slane %v3759_v18, %v4336_v32  ;;  %v1646_v10 = vcombine.low %v1436_v58, %v1443_v52  ;;  %2360 = vadd.xlane.f32.xlu0 %v2359_v23  ;;  %v4789_v0 = vpop.eup %4065 }
 0x4c5   :  { %v1619_v35 = vrot.slane %v1612_v25, %v4336_v32  ;;  %v1627_v37 = vrot.slane %v3760_v60, %v4336_v32  ;;  %v3761_v11 = vcombine.high %v1436_v58, %v1443_v52  ;;  %v2344_v34 = vsel %vm2232_vm4, %v4783_v8, 0.0 }
 0x4c6   :  { %v1662_v29 = vcombine.low %v1452_v61, %v1459_v63  ;;  %v3762_v54 = vcombine.high %v1452_v61, %v1459_v63  ;;  %2333 = vadd.xlane.f32.xlu1 %v2332_v22  ;;  %v1653_v2 = vrot.slane %v1646_v10, %v4336_v32  ;;  %v1628_v48 = vcombine.low %v1603_v51, %v1611_v50 }
 0x4c7   :  { %v1636_v49 = vcombine.low %v1619_v35, %v1627_v37  ;;  %v1661_v59 = vrot.slane %v3761_v11, %v4336_v32  ;;  %v2350_v26 = vsel %vm2232_vm4, %v4789_v0, 0.0  ;;  %v2293_v18 = vsub.f32 %v4667_v27, %v4732_v39 }
 0x4c8   :  { %v1669_v13 = vrot.slane %v1662_v29, %v4336_v32  ;;  %v1677_v7 = vrot.slane %v3762_v54, %v4336_v32  ;;  %v1635_v30 = vrot.slane %v1628_v48, %v4347_v44  ;;  %v2290_v50 = vsub.f32 %v4637_v19, %v4714_v3 }
 0x4c9   :  { %v1643_v31 = vrot.slane %v1636_v49, %v4347_v44  ;;  %v1678_v46 = vcombine.low %v1653_v2, %v1661_v59  ;;  %v2321_v63 = vmul.f32 1.442695, %v2293_v18 }
 0x4ca   :  { %2345 = vadd.xlane.f32.xlu1 %v2344_v34  ;;  %v1686_v4 = vcombine.low %v1669_v13, %v1677_v7  ;;  %v2315_v37 = vmul.f32 1.442695, %v2290_v50 }
 0x4cb   :  { %v1644_v33 = vcombine.low %v1635_v30, %v1643_v31  ;;  %v4795_v12 = vcombine.high %v1635_v30, %v1643_v31  ;;  %v1685_v55 = vrot.slane %v1678_v46, %v4347_v44 }
 0x4cc   :  { %v1693_v56 = vrot.slane %v1686_v4, %v4347_v44 }
 0x4cd   :  { %v1800_v40 = vshrl.u32 %v1644_v33, 16  ;;  %v1808_v43 = vshrl.u32 %v4795_v12, 16 }
 0x4ce   :  { %2351 = vadd.xlane.f32.xlu1 %v2350_v26  ;;  %v1694_v17 = vcombine.low %v1685_v55, %v1693_v56  ;;  %v4801_v6 = vcombine.high %v1685_v55, %v1693_v56 }
 0x4d0   :  { %v1798_v22 = vpack.i.b16 %v1694_v17, %v1644_v33  ;;  %v1801_v58 = vshrl.u32 %v1694_v17, 16  ;;  %v1809_v42 = vshrl.u32 %v4801_v6, 16  ;;  %v1806_v41 = vpack.i.b16 %v4801_v6, %v4795_v12 }
 0x4d2   :  { %3927 = vmatpush3.bf16.msra.mxu1 %v1798_v22  ;;  %v1802_v45 = vpack.i.b16 %v1801_v58, %v1800_v40  ;;  %v4807_v52 = vpack.i.b16 %v1809_v42, %v1808_v43 }
 0x4d3   :  { %3938 = vmatprep.subr.bf16.mxu1 %v4167_v15 }
 0x4d4   :  { %3933 = vmatpush3.bf16.msra.mxu0 %v1802_v45 }
 0x4d5   :  { %3944 = vmatprep.subr.bf16.mxu0 %v4167_v15 }
 0x4df   :  { %1298 = vrot.lane.b32.xlu1 %v4312_v14, %s4172_s26  ;;  %v2294_v14 = vsub.f32 %v4661_v47, %v4728_v38 }
 0x4e1   :  { %v2323_v27 = vmul.f32 1.442695, %v2294_v14 }
 0x4e7   :  { %v2277_v25 = vpop.xlane.xlu0 %2276 }
 0x4e8   :  { %v2295_v51 = vsub.f32 %v4685_v21, %v2277_v25 }
 0x4e9   :  { %v2268_v60 = vpop.xlane.xlu1 %2267 }
 0x4ea   :  { %v2292_v61 = vsub.f32 %v4679_v57, %v2268_v60  ;;  %v2325_v35 = vmul.f32 1.442695, %v2295_v51 }
 0x4eb   :  { %v1287_v7 = vpop.permute.xlu0 %1286 }
 0x4ec   :  { %v2319_v23 = vmul.f32 1.442695, %v2292_v61 }
 0x4ed   :  { %v1291_v54 = vpop.permute.xlu1 %1290 }
 0x4ee   :  { %4067 = vpow2.f32 %v2319_v23  ;;  %v1321_v43 = vshrl.u32 %v1291_v54, 16  ;;  %v1318_v22 = vpack.i.b16 %v1291_v54, %v1287_v7 }
 0x4ef   :  { %4069 = vpow2.f32 %v2321_v63 }
 0x4f0   :  { %4071 = vpow2.f32 %v2325_v35  ;;  %v1464_v25 = vcombine.high %v1318_v22, %v4327_v24  ;;  %v1471_v14 = vrot.slane %v1318_v22, %v4336_v32 }
 0x4f1   :  { %4073 = vpow2.f32 %v2315_v37 }
 0x4f2   :  { %4075 = vpow2.f32 %v2323_v27 }
 0x4f8   :  { %v4821_v39 = vpop.eup %4067 }
 0x4f9   :  { %v2362_v57 = vsel %vm2232_vm4, %v4821_v39, 0.0  ;;  %v4825_v21 = vpop.eup %4069 }
 0x4fa   :  { %2363 = vadd.xlane.f32.xlu0 %v2362_v57  ;;  %v2365_v19 = vsel %vm2232_vm4, %v4825_v21, 0.0  ;;  %v4829_v3 = vpop.eup %4071 }
 0x4fb   :  { %v4831_v10 = vpop.eup %4073  ;;  %v2371_v47 = vsel %vm2232_vm4, %v4829_v3, 0.0 }
 0x4fc   :  { %v2356_v38 = vsel %vm2232_vm4, %v4831_v10, 0.0  ;;  %v4837_v11 = vpop.eup %4075 }
 0x4fd   :  { %v2368_v29 = vsel %vm2232_vm4, %v4837_v11, 0.0 }
 0x4fe   :  { %2366 = vadd.xlane.f32.xlu0 %v2365_v19  ;;  %v1478_v19 = vrot.slane %v1464_v25, %v4336_v32 }
 0x502   :  { %2372 = vadd.xlane.f32.xlu0 %v2371_v47 }
 0x503   :  { %2357 = vadd.xlane.f32.xlu1 %v2356_v38 }
 0x507   :  { %2369 = vadd.xlane.f32.xlu1 %v2368_v29 }
 0x51e   :  { %v2280_v2 = vpop.xlane.xlu1 %2279 }
 0x51f   :  { %v2296_v48 = vsub.f32 %v4689_v20, %v2280_v2 }
 0x521   :  { %v2327_v49 = vmul.f32 1.442695, %v2296_v48 }
 0x522   :  { %v1295_v55 = vpop.permute.xlu1 %1294 }
 0x523   :  { %4077 = vpow2.f32 %v2327_v49  ;;  %v1328_v23 = vshrl.u32 %v1295_v55, 16 }
 0x52d   :  { %v4842_v59 = vpop.eup %4077 }
 0x52e   :  { %v2374_v13 = vsel %vm2232_vm4, %v4842_v59, 0.0 }
 0x52f   :  { %2375 = vadd.xlane.f32.xlu1 %v2374_v13 }
 0x534   :  { %v2331_v34 = vpop.xlane.xlu0 %2330 }
 0x538   :  { %v2343_v30 = vpop.xlane.xlu0 %2342 }
 0x53c   :  { %v2337_v31 = vpop.xlane.xlu0 %2336 }
 0x53d   :  { %4079 = vrcp.f32 %v2337_v31 }
 0x544   :  { %v2340_v46 = vpop.xlane.xlu0 %2339 }
 0x545   :  { %4081 = vrcp.f32 %v2340_v46 }
 0x546   :  { %4083 = vrcp.f32 %v2331_v34 }
 0x547   :  { %v4080_v4 = vpop.eup %4079 }
 0x548   :  { %v2395_v20 = vmul.f32 %v4080_v4, %v4730_v1  ;;  %v2349_v40 = vpop.xlane.xlu0 %2348 }
 0x54f   :  { %v4082_v33 = vpop.eup %4081 }
 0x550   :  { %v2396_v56 = vmul.f32 %v4082_v33, %v4738_v16  ;;  %v1320_v16 = vshrl.u32 %v1287_v7, 16  ;;  %v4084_v45 = vpop.eup %4083 }
 0x551   :  { %v2393_v60 = vmul.f32 %v4084_v45, %v4716_v53 }
 0x552   :  { %v2410_v26 = vpack.c.bf16 %v2396_v56, %v2395_v20  ;;  %v1322_v58 = vpack.i.b16 %v1321_v43, %v1320_v16 }
 0x553   :  { %v2334_v17 = vpop.xlane.xlu1 %2333 }
 0x554   :  { %4085 = vrcp.f32 %v2334_v17  ;;  %3935 = vmatmul.mubr.msk.bf16.vlgmr.msra.gmra.mrb[24].mxu0 %vm2232_vm4, %v2410_v26  ;;  %v1537_v53 = vrot.slane %v1322_v58, %v4336_v32 }
 0x555   :  { %3945 = vmatpush3.bf16.msra.mxu0 %v4807_v52  ;;  %3946 = vmatprep.mubr.msk.bf16.mxu0 %vm4168_vm1, %v4167_v15  ;;  %4087 = vrcp.f32 %v2343_v30  ;;  %v1530_v52 = vcombine.high %v1322_v58, %v4327_v24 }
 0x556   :  { %3956 = vmatprep.subr.bf16.mxu0 %v4167_v15  ;;  %4089 = vrcp.f32 %v2349_v40 }
 0x557   :  { %v2346_v1 = vpop.xlane.xlu1 %2345 }
 0x558   :  { %4091 = vrcp.f32 %v2346_v1 }
 0x55b   :  { %v2352_v42 = vpop.xlane.xlu1 %2351 }
 0x55c   :  { %4093 = vrcp.f32 %v2352_v42 }
 0x55e   :  { %v4086_v18 = vpop.eup %4085 }
 0x55f   :  { %v2394_v61 = vmul.f32 %v4086_v18, %v4759_v62  ;;  %v1299_v63 = vpop.permute.xlu1 %1298  ;;  %v4088_v51 = vpop.eup %4087  ;;  %v1544_v62 = vrot.slane %v1530_v52, %v4336_v32 }
 0x560   :  { %v1326_v50 = vpack.i.b16 %v1299_v63, %v1295_v55  ;;  %v1329_v35 = vshrl.u32 %v1299_v63, 16  ;;  %v4090_v37 = vpop.eup %4089  ;;  %v2397_v54 = vmul.f32 %v4088_v51, %v4722_v36 }
 0x561   :  { %v2409_v27 = vpack.c.bf16 %v2394_v61, %v2393_v60  ;;  %v2399_v34 = vmul.f32 %v4090_v37, %v4743_v28 }
 0x562   :  { %v4092_v57 = vpop.eup %4091  ;;  %v1330_v47 = vpack.i.b16 %v1329_v35, %v1328_v23  ;;  %v1479_v38 = vcombine.high %v1326_v50, %v4327_v24  ;;  %v1486_v29 = vrot.slane %v1326_v50, %v4336_v32 }
 0x563   :  { %v2398_v2 = vmul.f32 %v4092_v57, %v4783_v8  ;;  %3929 = vmatmul.mubr.msk.bf16.vlgmr.msra.gmra.mrb[12].mxu1 %vm2232_vm4, %v2409_v27 }
 0x564   :  { %v1493_v48 = vrot.slane %v1479_v38, %v4336_v32  ;;  %v1494_v49 = vcombine.low %v1471_v14, %v1486_v29  ;;  %v1495_v13 = vcombine.high %v1471_v14, %v1486_v29  ;;  %v1545_v7 = vcombine.high %v1330_v47, %v4327_v24  ;;  %3939 = vmatpush3.bf16.msra.mxu1 %v1806_v41 }
 0x565   :  { %v1552_v30 = vrot.slane %v1330_v47, %v4336_v32  ;;  %3940 = vmatprep.mubr.msk.bf16.mxu1 %vm4168_vm1, %v4167_v15  ;;  %v2411_v36 = vpack.c.bf16 %v2398_v2, %v2397_v54  ;;  %3950 = vmatprep.subr.bf16.mxu1 %v4167_v15 }
 0x566   :  { %v4094_v8 = vpop.eup %4093  ;;  %v1502_v31 = vrot.slane %v1494_v49, %v4347_v44  ;;  %v1509_v46 = vrot.slane %v1495_v13, %v4347_v44  ;;  %v1510_v4 = vcombine.low %v1478_v19, %v1493_v48  ;;  %v1511_v33 = vcombine.high %v1478_v19, %v1493_v48 }
 0x567   :  { %v2400_v12 = vmul.f32 %v4094_v8, %v4789_v0  ;;  %v1559_v6 = vrot.slane %v1545_v7, %v4336_v32  ;;  %v1560_v28 = vcombine.low %v1537_v53, %v1552_v30  ;;  %v1561_v41 = vcombine.high %v1537_v53, %v1552_v30  ;;  %v2355_v7 = vpop.xlane.xlu0 %2354 }
 0x568   :  { %v1518_v55 = vrot.slane %v1510_v4, %v4347_v44  ;;  %v1525_v20 = vrot.slane %v1511_v33, %v4347_v44  ;;  %v1696_v56 = vcombine.low %v1502_v31, %v1509_v46  ;;  %v3763_v26 = vcombine.high %v1502_v31, %v1509_v46 }
 0x569   :  { %v1568_v17 = vrot.slane %v1560_v28, %v4347_v44  ;;  %v1575_v40 = vrot.slane %v1561_v41, %v4347_v44  ;;  %v1576_v43 = vcombine.low %v1544_v62, %v1559_v6  ;;  %v1577_v1 = vcombine.high %v1544_v62, %v1559_v6 }
 0x56a   :  { %v1703_v16 = vrot.slane %v1696_v56, %v4336_v32  ;;  %v1711_v0 = vrot.slane %v3763_v26, %v4336_v32  ;;  %v1712_v22 = vcombine.low %v1518_v55, %v1525_v20  ;;  %v3764_v58 = vcombine.high %v1518_v55, %v1525_v20 }
 0x56b   :  { %v1584_v42 = vrot.slane %v1576_v43, %v4347_v44  ;;  %v1591_v45 = vrot.slane %v1577_v1, %v4347_v44  ;;  %v1746_v18 = vcombine.low %v1568_v17, %v1575_v40  ;;  %v3765_v25 = vcombine.high %v1568_v17, %v1575_v40  ;;  %3941 = vmatmul.mubr.msk.bf16.vlgmr.msra.gmra.mrb[16].mxu1 %vm2232_vm4, %v2411_v36 }
 0x56c   :  { %v1719_v52 = vrot.slane %v1712_v22, %v4336_v32  ;;  %v1727_v60 = vrot.slane %v3764_v58, %v4336_v32  ;;  %v2412_v61 = vpack.c.bf16 %v2400_v12, %v2399_v34  ;;  %v1728_v63 = vcombine.low %v1703_v16, %v1711_v0  ;;  %3952 = vmatprep.mubr.msk.bf16.mxu1 %vm4168_vm1, %v4167_v15  ;;  %v2361_v34 = vpop.xlane.xlu0 %2360 }
 0x56d   :  { %v1753_v51 = vrot.slane %v1746_v18, %v4336_v32  ;;  %v1761_v23 = vrot.slane %v3765_v25, %v4336_v32  ;;  %v1762_v50 = vcombine.low %v1584_v42, %v1591_v45  ;;  %v3766_v35 = vcombine.high %v1584_v42, %v1591_v45 }
 0x56e   :  { %3947 = vmatmul.mubr.msk.bf16.vlgmr.msra.gmra.mrb[28].mxu0 %vm2232_vm4, %v2412_v61  ;;  %v1736_v37 = vcombine.low %v1719_v52, %v1727_v60  ;;  %v1735_v47 = vrot.slane %v1728_v63, %v4347_v44  ;;  %4095 = vrcp.f32 %v2361_v34 }
 0x56f   :  { %v1769_v14 = vrot.slane %v1762_v50, %v4336_v32  ;;  %v1777_v27 = vrot.slane %v3766_v35, %v4336_v32  ;;  %v1778_v57 = vcombine.low %v1753_v51, %v1761_v23  ;;  %3958 = vmatprep.mubr.msk.bf16.mxu0 %vm4168_vm1, %v4167_v15 }
 0x570   :  { %v1743_v19 = vrot.slane %v1736_v37, %v4347_v44 }
 0x571   :  { %v1786_v38 = vcombine.low %v1769_v14, %v1777_v27  ;;  %v1785_v53 = vrot.slane %v1778_v57, %v4347_v44 }
 0x572   :  { %v1744_v29 = vcombine.low %v1735_v47, %v1743_v19  ;;  %v1745_v46 = vcombine.high %v1735_v47, %v1743_v19 }
 0x573   :  { %v1793_v62 = vrot.slane %v1786_v38, %v4347_v44 }
 0x574   :  { %v1816_v48 = vshrl.u32 %v1744_v29, 16  ;;  %v1824_v55 = vshrl.u32 %v1745_v46, 16 }
 0x575   :  { %v1794_v54 = vcombine.low %v1785_v53, %v1793_v62  ;;  %v1795_v36 = vcombine.high %v1785_v53, %v1793_v62 }
 0x577   :  { %v1814_v2 = vpack.i.b16 %v1794_v54, %v1744_v29  ;;  %v1817_v49 = vshrl.u32 %v1794_v54, 16  ;;  %v1825_v33 = vshrl.u32 %v1795_v36, 16  ;;  %v1822_v1 = vpack.i.b16 %v1795_v36, %v1745_v46 }
 0x578   :  { %v4096_v8 = vpop.eup %4095 }
 0x579   :  { %3951 = vmatpush3.bf16.msra.mxu1 %v1814_v2  ;;  %v1818_v13 = vpack.i.b16 %v1817_v49, %v1816_v48  ;;  %v2403_v12 = vmul.f32 %v4096_v8, %v4767_v5  ;;  %v1826_v56 = vpack.i.b16 %v1825_v33, %v1824_v55 }
 0x57a   :  { %3962 = vmatprep.subr.bf16.mxu1 %v4167_v15 }
 0x57b   :  { %3957 = vmatpush3.bf16.msra.mxu0 %v1818_v13 }
 0x57c   :  { %3968 = vmatprep.subr.bf16.mxu0 %v4167_v15 }
 0x587   :  { %v2364_v30 = vpop.xlane.xlu0 %2363 }
 0x588   :  { %4097 = vrcp.f32 %v2364_v30 }
 0x589   :  { %4099 = vrcp.f32 %v2355_v7 }
 0x58b   :  { %v2367_v28 = vpop.xlane.xlu0 %2366 }
 0x590   :  { %v2358_v31 = vpop.xlane.xlu1 %2357 }
 0x591   :  { %4101 = vrcp.f32 %v2358_v31 }
 0x592   :  { %v4098_v4 = vpop.eup %4097 }
 0x593   :  { %v2404_v6 = vmul.f32 %v4098_v4, %v4821_v39  ;;  %v4100_v26 = vpop.eup %4099 }
 0x594   :  { %v2370_v41 = vpop.xlane.xlu1 %2369  ;;  %v2401_v40 = vmul.f32 %v4100_v26, %v4746_v9  ;;  %v2373_v9 = vpop.xlane.xlu0 %2372 }
 0x595   :  { %4103 = vrcp.f32 %v2370_v41  ;;  %v2414_v20 = vpack.c.bf16 %v2404_v6, %v2403_v12 }
 0x596   :  { %4105 = vrcp.f32 %v2367_v28 }
 0x597   :  { %3959 = vmatmul.mubr.msk.bf16.vlgmr.msra.gmra.mrb[32].mxu0 %vm2232_vm4, %v2414_v20  ;;  %4107 = vrcp.f32 %v2373_v9 }
 0x598   :  { %3969 = vmatpush3.bf16.msra.mxu0 %v1826_v56  ;;  %3970 = vmatprep.mubr.msk.bf16.mxu0 %vm4168_vm1, %v4167_v15 }
 0x59b   :  { %v4102_v17 = vpop.eup %4101 }
 0x59c   :  { %v2402_v5 = vmul.f32 %v4102_v17, %v4831_v10 }
 0x59e   :  { %v2413_v39 = vpack.c.bf16 %v2402_v5, %v2401_v40 }
 0x59f   :  { %v4104_v43 = vpop.eup %4103 }
 0x5a0   :  { %3953 = vmatmul.mubr.msk.bf16.vlgmr.msra.gmra.mrb[20].mxu1 %vm2232_vm4, %v2413_v39  ;;  %v4106_v16 = vpop.eup %4105  ;;  %v2406_v0 = vmul.f32 %v4104_v43, %v4837_v11 }
 0x5a1   :  { %3963 = vmatpush3.bf16.msra.mxu1 %v1822_v1  ;;  %3964 = vmatprep.mubr.msk.bf16.mxu1 %vm4168_vm1, %v4167_v15  ;;  %v2405_v22 = vmul.f32 %v4106_v16, %v4825_v21  ;;  %v4108_v42 = vpop.eup %4107 }
 0x5a2   :  { %v2407_v18 = vmul.f32 %v4108_v42, %v4829_v3 }
 0x5a3   :  { %v2415_v58 = vpack.c.bf16 %v2406_v0, %v2405_v22 }
 0x5a8   :  { %3965 = vmatmul.mubr.msk.bf16.vlgmr.msra.gmra.mrb[24].mxu1 %vm2232_vm4, %v2415_v58 }
 0x5bc   :  { %v2376_v10 = vpop.xlane.xlu1 %2375 }
 0x5bd   :  { %4109 = vrcp.f32 %v2376_v10 }
 0x5c7   :  { %v4110_v45 = vpop.eup %4109 }
 0x5c8   :  { %v2408_v25 = vmul.f32 %v4110_v45, %v4842_v59 }
 0x5ca   :  { %v2416_v52 = vpack.c.bf16 %v2408_v25, %v2407_v18 }
 0x5cc   :  { %3971 = vmatmul.mubr.msk.bf16.vlgmr.msra.gmra.mrb[36].mxu0 %vm2232_vm4, %v2416_v52 }
 0x627   :  { %v2498_v15 = vpop.f32.mrb[24].mxu0 }
 0x628   :  { %v3936_v11 = vpop.f32.mrb[25].mxu0 }
 0x629   :  { %v2501_v60 = vpop.f32.mrb[26].mxu0 }
 0x62a   :  { %v2770_v21 = vpack.c.bf16 %v2501_v60, %v2498_v15  ;;  %v3937_v61 = vpop.f32.mrb[27].mxu0 }
 0x62c   :  { %v2782_v37 = vshrl.u32 %v2770_v21, 16 }
 0x636   :  { %v2454_v63 = vpop.f32.mrb[12].mxu1 }
 0x637   :  { %v3930_v51 = vpop.f32.mrb[13].mxu1 }
 0x638   :  { %v2457_v23 = vpop.f32.mrb[14].mxu1 }
 0x639   :  { %v2769_v50 = vpack.c.bf16 %v2457_v23, %v2454_v63  ;;  %v3931_v35 = vpop.f32.mrb[15].mxu1 }
 0x63b   :  { %v2779_v14 = vpack.i.b16 %v2770_v21, %v2769_v50  ;;  %v2781_v27 = vshrl.u32 %v2769_v50, 16 }
 0x63d   :  { %v2783_v57 = vpack.i.b16 %v2782_v37, %v2781_v27  ;;  %v2809_v49 = vcombine.high %v2779_v14, %v4327_v24  ;;  %v2816_v34 = vrot.slane %v2779_v14, %v4336_v32 }
 0x63e   :  { %v2542_v3 = vpop.f32.mrb[16].mxu1 }
 0x63f   :  { %v3942_v19 = vpop.f32.mrb[17].mxu1  ;;  %v2823_v31 = vrot.slane %v2809_v49, %v4336_v32  ;;  %v2875_v46 = vcombine.high %v2783_v57, %v4327_v24  ;;  %v2882_v28 = vrot.slane %v2783_v57, %v4336_v32 }
 0x640   :  { %v2545_v59 = vpop.f32.mrb[18].mxu1 }
 0x641   :  { %v2586_v47 = vpop.f32.mrb[28].mxu0  ;;  %v2771_v38 = vpack.c.bf16 %v2545_v59, %v2542_v3  ;;  %v3943_v29 = vpop.f32.mrb[19].mxu1  ;;  %v2889_v17 = vrot.slane %v2875_v46, %v4336_v32 }
 0x642   :  { %v3948_v53 = vpop.f32.mrb[29].mxu0 }
 0x643   :  { %v2589_v62 = vpop.f32.mrb[30].mxu0  ;;  %v2789_v54 = vshrl.u32 %v2771_v38, 16 }
 0x644   :  { %v2772_v2 = vpack.c.bf16 %v2589_v62, %v2586_v47  ;;  %v3949_v48 = vpop.f32.mrb[31].mxu0 }
 0x646   :  { %v2787_v13 = vpack.i.b16 %v2772_v2, %v2771_v38  ;;  %v2790_v7 = vshrl.u32 %v2772_v2, 16 }
 0x648   :  { %v2791_v30 = vpack.i.b16 %v2790_v7, %v2789_v54  ;;  %v2824_v36 = vcombine.high %v2787_v13, %v4327_v24  ;;  %v2831_v8 = vrot.slane %v2787_v13, %v4336_v32 }
 0x64a   :  { %v2838_v4 = vrot.slane %v2824_v36, %v4336_v32  ;;  %v2839_v33 = vcombine.low %v2816_v34, %v2831_v8  ;;  %v2840_v12 = vcombine.high %v2816_v34, %v2831_v8  ;;  %v2890_v6 = vcombine.high %v2791_v30, %v4327_v24 }
 0x64b   :  { %v2897_v41 = vrot.slane %v2791_v30, %v4336_v32 }
 0x64c   :  { %v2847_v55 = vrot.slane %v2839_v33, %v4347_v44  ;;  %v2854_v20 = vrot.slane %v2840_v12, %v4347_v44  ;;  %v2855_v56 = vcombine.low %v2823_v31, %v2838_v4  ;;  %v2856_v26 = vcombine.high %v2823_v31, %v2838_v4 }
 0x64d   :  { %v2904_v40 = vrot.slane %v2890_v6, %v4336_v32  ;;  %v2905_v5 = vcombine.low %v2882_v28, %v2897_v41  ;;  %v2906_v39 = vcombine.high %v2882_v28, %v2897_v41 }
 0x64e   :  { %v2863_v43 = vrot.slane %v2855_v56, %v4347_v44  ;;  %v2870_v1 = vrot.slane %v2856_v26, %v4347_v44  ;;  %v3073_v16 = vcombine.low %v2847_v55, %v2854_v20  ;;  %v3783_v0 = vcombine.high %v2847_v55, %v2854_v20 }
 0x64f   :  { %v2913_v22 = vrot.slane %v2905_v5, %v4347_v44  ;;  %v2920_v58 = vrot.slane %v2906_v39, %v4347_v44  ;;  %v2921_v9 = vcombine.low %v2889_v17, %v2904_v40  ;;  %v2922_v10 = vcombine.high %v2889_v17, %v2904_v40 }
 0x650   :  { %v3089_v42 = vcombine.low %v2863_v43, %v2870_v1  ;;  %v3784_v45 = vcombine.high %v2863_v43, %v2870_v1  ;;  %v3080_v18 = vrot.slane %v3073_v16, %v4336_v32  ;;  %v3088_v25 = vrot.slane %v3783_v0, %v4336_v32 }
 0x651   :  { %v2929_v52 = vrot.slane %v2921_v9, %v4347_v44  ;;  %v2936_v15 = vrot.slane %v2922_v10, %v4347_v44  ;;  %v3123_v11 = vcombine.low %v2913_v22, %v2920_v58  ;;  %v3785_v60 = vcombine.high %v2913_v22, %v2920_v58 }
 0x652   :  { %v3096_v21 = vrot.slane %v3089_v42, %v4336_v32  ;;  %v3104_v61 = vrot.slane %v3784_v45, %v4336_v32  ;;  %v3105_v63 = vcombine.low %v3080_v18, %v3088_v25 }
 0x653   :  { %v3130_v51 = vrot.slane %v3123_v11, %v4336_v32  ;;  %v3138_v23 = vrot.slane %v3785_v60, %v4336_v32  ;;  %v3139_v50 = vcombine.low %v2929_v52, %v2936_v15  ;;  %v3786_v35 = vcombine.high %v2929_v52, %v2936_v15 }
 0x654   :  { %v3113_v37 = vcombine.low %v3096_v21, %v3104_v61  ;;  %v3112_v3 = vrot.slane %v3105_v63, %v4347_v44 }
 0x655   :  { %v3146_v14 = vrot.slane %v3139_v50, %v4336_v32  ;;  %v3154_v27 = vrot.slane %v3786_v35, %v4336_v32  ;;  %v3155_v57 = vcombine.low %v3130_v51, %v3138_v23 }
 0x656   :  { %v3120_v19 = vrot.slane %v3113_v37, %v4347_v44 }
 0x657   :  { %v3163_v59 = vcombine.low %v3146_v14, %v3154_v27  ;;  %v3162_v29 = vrot.slane %v3155_v57, %v4347_v44 }
 0x658   :  { %v3122_v47 = vcombine.high %v3112_v3, %v3120_v19  ;;  %v4952_v38 = vcombine.low %v3112_v3, %v3120_v19 }
 0x659   :  { %v3170_v53 = vrot.slane %v3163_v59, %v4347_v44 }
 0x65a   :  { %v3276_v2 = vshrl.u32 %v4952_v38, 16  ;;  %v3282_v48 = vshrl.u32 %v3122_v47, 16 }
 0x65b   :  { %v3172_v62 = vcombine.high %v3162_v29, %v3170_v53  ;;  %v4956_v54 = vcombine.low %v3162_v29, %v3170_v53 }
 0x65d   :  { %v3281_v49 = vpack.i.b16 %v3172_v62, %v3122_v47  ;;  %v3277_v13 = vshrl.u32 %v4956_v54, 16  ;;  %v3283_v7 = vshrl.u32 %v3172_v62, 16  ;;  %v3275_v34 = vpack.i.b16 %v4956_v54, %v4952_v38  ;;  %v3791_v38 = vld [vmem:[%s5125_s6] ss:$0 sm:$0xff] }
 0x65f   :  { %3301 = vrot.lane.b32.xlu1 %v3281_v49, %s4173_s27  ;;  %v3278_v30 = vpack.i.b16 %v3277_v13, %v3276_v2  ;;  %v3284_v36 = vpack.i.b16 %v3283_v7, %v3282_v48 }
 0x661   :  { %3297 = vrot.lane.b32.xlu0 %v3278_v30, %s4174_s28 }
 0x665   :  { %3305 = vrot.lane.b32.xlu0 %v3284_v36, %s4175_s29 }
 0x66a   :  { %v2674_v8 = vpop.f32.mrb[32].mxu0 }
 0x66b   :  { %v3960_v31 = vpop.f32.mrb[33].mxu0 }
 0x66c   :  { %v2677_v46 = vpop.f32.mrb[34].mxu0 }
 0x66d   :  { %v2774_v4 = vpack.c.bf16 %v2677_v46, %v2674_v8  ;;  %v3961_v33 = vpop.f32.mrb[35].mxu0 }
 0x66f   :  { %v2798_v20 = vshrl.u32 %v2774_v4, 16 }
 0x673   :  { %v2630_v12 = vpop.f32.mrb[20].mxu1 }
 0x674   :  { %v3954_v6 = vpop.f32.mrb[21].mxu1 }
 0x675   :  { %v2633_v28 = vpop.f32.mrb[22].mxu1 }
 0x676   :  { %v2773_v41 = vpack.c.bf16 %v2633_v28, %v2630_v12  ;;  %v3955_v55 = vpop.f32.mrb[23].mxu1  ;;  %v4027_v12 = vld [vmem:[%s5124_s5] sm:$0xff]  }
 0x677   :  { %3974 = vmatprep.subr.bf16.mxu1 %v4027_v12 }
 0x678   :  { %v2795_v56 = vpack.i.b16 %v2774_v4, %v2773_v41  ;;  %v2797_v26 = vshrl.u32 %v2773_v41, 16  ;;  %3975 = vmatpush3.bf16.msra.mxu1 %v4027_v12 }
 0x67a   :  { %v2799_v17 = vpack.i.b16 %v2798_v20, %v2797_v26  ;;  %v2941_v10 = vcombine.high %v2795_v56, %v4327_v24  ;;  %v2948_v25 = vrot.slane %v2795_v56, %v4336_v32 }
 0x67b   :  { %v2718_v40 = vpop.f32.mrb[24].mxu1 }
 0x67c   :  { %v3966_v5 = vpop.f32.mrb[25].mxu1  ;;  %v2955_v60 = vrot.slane %v2941_v10, %v4336_v32  ;;  %v3007_v21 = vcombine.high %v2799_v17, %v4327_v24  ;;  %v3014_v50 = vrot.slane %v2799_v17, %v4336_v32 }
 0x67d   :  { %v2721_v39 = vpop.f32.mrb[26].mxu1 }
 0x67e   :  { %v2775_v43 = vpack.c.bf16 %v2721_v39, %v2718_v40  ;;  %v3967_v1 = vpop.f32.mrb[27].mxu1  ;;  %v3021_v3 = vrot.slane %v3007_v21, %v4336_v32 }
 0x680   :  { %v2805_v42 = vshrl.u32 %v2775_v43, 16 }
 0x69f   :  { %v2762_v16 = vpop.f32.mrb[36].mxu0 }
 0x6a0   :  { %v3972_v0 = vpop.f32.mrb[37].mxu0 }
 0x6a1   :  { %v2765_v22 = vpop.f32.mrb[38].mxu0 }
 0x6a2   :  { %v2776_v58 = vpack.c.bf16 %v2765_v22, %v2762_v16  ;;  %v3973_v9 = vpop.f32.mrb[39].mxu0  ;;  %v4028_v16 = vld [vmem:[%s5124_s5 + $0x8] sm:$0xff]  }
 0x6a3   :  { %3976 = vmatprep.subr.bf16.mxu1 %v4028_v16 }
 0x6a4   :  { %v2803_v45 = vpack.i.b16 %v2776_v58, %v2775_v43  ;;  %v2806_v18 = vshrl.u32 %v2776_v58, 16  ;;  %3977 = vmatpush3.bf16.msra.mxu1 %v4028_v16 }
 0x6a6   :  { %v2807_v52 = vpack.i.b16 %v2806_v18, %v2805_v42  ;;  %v2956_v15 = vcombine.high %v2803_v45, %v4327_v24  ;;  %v2963_v11 = vrot.slane %v2803_v45, %v4336_v32 }
 0x6a8   :  { %v2970_v61 = vrot.slane %v2956_v15, %v4336_v32  ;;  %v2971_v63 = vcombine.low %v2948_v25, %v2963_v11  ;;  %v2972_v51 = vcombine.high %v2948_v25, %v2963_v11  ;;  %v3022_v23 = vcombine.high %v2807_v52, %v4327_v24 }
 0x6a9   :  { %v3029_v35 = vrot.slane %v2807_v52, %v4336_v32 }
 0x6aa   :  { %v2979_v37 = vrot.slane %v2971_v63, %v4347_v44  ;;  %v2986_v14 = vrot.slane %v2972_v51, %v4347_v44  ;;  %v2987_v27 = vcombine.low %v2955_v60, %v2970_v61  ;;  %v2988_v57 = vcombine.high %v2955_v60, %v2970_v61 }
 0x6ab   :  { %v3036_v19 = vrot.slane %v3022_v23, %v4336_v32  ;;  %v3037_v59 = vcombine.low %v3014_v50, %v3029_v35  ;;  %v3038_v47 = vcombine.high %v3014_v50, %v3029_v35 }
 0x6ac   :  { %v2995_v29 = vrot.slane %v2987_v27, %v4347_v44  ;;  %v3002_v24 = vrot.slane %v2988_v57, %v4347_v44  ;;  %v3173_v53 = vcombine.low %v2979_v37, %v2986_v14  ;;  %v3787_v62 = vcombine.high %v2979_v37, %v2986_v14 }
 0x6ad   :  { %v3045_v2 = vrot.slane %v3037_v59, %v4347_v44  ;;  %v3052_v48 = vrot.slane %v3038_v47, %v4347_v44  ;;  %v3053_v49 = vcombine.low %v3021_v3, %v3036_v19  ;;  %v3054_v13 = vcombine.high %v3021_v3, %v3036_v19 }
 0x6ae   :  { %v3189_v7 = vcombine.low %v2995_v29, %v3002_v24  ;;  %v3788_v30 = vcombine.high %v2995_v29, %v3002_v24  ;;  %v3180_v36 = vrot.slane %v3173_v53, %v4336_v32  ;;  %v3188_v8 = vrot.slane %v3787_v62, %v4336_v32  ;;  %v4135_v24 = vld [vmem:[%s5119_s0] sm:$0xff] }
 0x6af   :  { %v3061_v31 = vrot.slane %v3053_v49, %v4347_v44  ;;  %v3068_v46 = vrot.slane %v3054_v13, %v4347_v44  ;;  %v3223_v4 = vcombine.low %v3045_v2, %v3052_v48  ;;  %v3789_v33 = vcombine.high %v3045_v2, %v3052_v48  ;;  %v4136_v2 = vld [vmem:[%s5119_s0 + $0x10] sm:$0xff]  ;;  %v4137_v13 = vld [vmem:[%s5119_s0 + $0x8] sm:$0xff] }
 0x6b0   :  { %v3196_v6 = vrot.slane %v3189_v7, %v4336_v32  ;;  %v3204_v28 = vrot.slane %v3788_v30, %v4336_v32  ;;  %v3205_v41 = vcombine.low %v3180_v36, %v3188_v8  ;;  %v4138_v8 = vld [vmem:[%s5119_s0 + $0x18] sm:$0xff]  ;;  %s4176_s0 = smov [#allocation2]  }
 0x6b1   :  { %v3230_v55 = vrot.slane %v3223_v4, %v4336_v32  ;;  %v3238_v20 = vrot.slane %v3789_v33, %v4336_v32  ;;  %v3239_v56 = vcombine.low %v3061_v31, %v3068_v46  ;;  %v3790_v26 = vcombine.high %v3061_v31, %v3068_v46  ;;  %s3725_s23 = sshll.u32 %s4176_s0, 4  ;;  %s3726_s23 = int_to_ptr.vmem [resolvable:$true] %s3725_s23 }
 0x6b2   :  { %v3213_v17 = vcombine.low %v3196_v6, %v3204_v28  ;;  %v3212_v43 = vrot.slane %v3205_v41, %v4347_v44  ;;  %p4144_p1 = scmp.lt.s32.totalorder %s3726_s23, %s3726_s23 }
 0x6b3   :  { %v3246_v40 = vrot.slane %v3239_v56, %v4336_v32  ;;  %v3254_v5 = vrot.slane %v3790_v26, %v4336_v32  ;;  %v3255_v39 = vcombine.low %v3230_v55, %v3238_v20 }
 0x6b4   :  { %v3220_v1 = vrot.slane %v3213_v17, %v4347_v44 }
 0x6b5   :  { %v3263_v0 = vcombine.low %v3246_v40, %v3254_v5  ;;  %v3262_v9 = vrot.slane %v3255_v39, %v4347_v44 }
 0x6b6   :  { %v3222_v22 = vcombine.high %v3212_v43, %v3220_v1  ;;  %v3221_v58 = vcombine.low %v3212_v43, %v3220_v1 }
 0x6b7   :  { %v3270_v10 = vrot.slane %v3263_v0, %v4347_v44 }
 0x6b8   :  { %v3288_v45 = vshrl.u32 %v3221_v58, 16  ;;  %v3294_v18 = vshrl.u32 %v3222_v22, 16 }
 0x6b9   :  { %v3272_v42 = vcombine.high %v3262_v9, %v3270_v10  ;;  %v3271_v32 = vcombine.low %v3262_v9, %v3270_v10  ;;  %v4029_v10 = vld [vmem:[%s5128_s9] sm:$0xff]  }
 0x6ba   :  { %3982 = vmatprep.subr.bf16.mxu0 %v4029_v10 }
 0x6bb   :  { %v3293_v25 = vpack.i.b16 %v3272_v42, %v3222_v22  ;;  %v3289_v52 = vshrl.u32 %v3271_v32, 16  ;;  %v3295_v15 = vshrl.u32 %v3272_v42, 16  ;;  %v3287_v11 = vpack.i.b16 %v3271_v32, %v3221_v58  ;;  %v4030_v42 = vld [vmem:[%s5128_s9 + $0x8] sm:$0xff]   ;;  %3983 = vmatpush3.bf16.msra.mxu0 %v4029_v10 }
 0x6bc   :  { %3984 = vmatprep.subr.bf16.mxu0 %v4030_v42 }
 0x6bd   :  { %3303 = vrot.lane.b32.xlu1 %v3293_v25, %s4173_s27  ;;  %v3290_v60 = vpack.i.b16 %v3289_v52, %v3288_v45  ;;  %v3296_v21 = vpack.i.b16 %v3295_v15, %v3294_v18 }
 0x6bf   :  { %3985 = vmatpush3.bf16.msra.mxu0 %v4030_v42 }
 0x6c1   :  { %3299 = vrot.lane.b32.xlu1 %v3290_v60, %s4174_s28 }
 0x6c5   :  { %3307 = vrot.lane.b32.xlu1 %v3296_v21, %s4175_s29 }
 0x6d1   :  { %v3302_v63 = vpop.permute.xlu1 %3301 }
 0x6d3   :  { %v3298_v61 = vpop.permute.xlu0 %3297 }
 0x6d4   :  { %v3311_v44 = vsel %vm1828_vm2, %v3275_v34, %v3298_v61 }
 0x6d5   :  { %v3316_v23 = vsel %vm2232_vm4, %v3311_v44, %v3302_v63 }
 0x6d7   :  { %v3306_v51 = vpop.permute.xlu0 %3305 }
 0x6d8   :  { %v3321_v50 = vsel %vm3319_vm6, %v3316_v23, %v3306_v51  ;;  %v3796_v23 = vld [vmem:[%s5126_s7] ss:$0 sm:$0xff] }
 0x6d9   :  { %3978 = vmatprep.mubr.msk.bf16.mxu1 %vm50_vm0, %v3321_v50 }
 0x72f   :  { %v3304_v35 = vpop.permute.xlu1 %3303 }
 0x733   :  { %v3300_v37 = vpop.permute.xlu1 %3299 }
 0x734   :  { %v3314_v14 = vsel %vm1828_vm2, %v3287_v11, %v3300_v37 }
 0x735   :  { %v3318_v57 = vsel %vm2232_vm4, %v3314_v14, %v3304_v35 }
 0x737   :  { %v3308_v27 = vpop.permute.xlu1 %3307 }
 0x738   :  { %v3323_v3 = vsel %vm3319_vm6, %v3318_v57, %v3308_v27  ;;  %v3797_v57 = vld [vmem:[%s5127_s8] ss:$0 sm:$0xff] }
 0x739   :  { %3979 = vmatmul.mubr.msk.bf16.vlgmr.msra.gmra.mrb[28].mxu1 %vm50_vm0, %v3323_v3 }
 0x80c   :  { %v3980_v54 = vpop.f32.mrb[28].mxu1 }
 0x80d   :  { %v3385_v34 = vpop.f32.mrb[29].mxu1  ;;  %v3394_v19 = vadd.f32 %v3980_v54, %v3791_v38 }
 0x80e   :  { %v3386_v59 = vadd.f32 %v3791_v38, %v3385_v34  ;;  %v3981_v47 = vpop.f32.mrb[30].mxu1 }
 0x80f   :  { %v3388_v29 = vpop.f32.mrb[31].mxu1  ;;  %v5026_v48 = vadd.f32 %v4136_v2, %v3394_v19  ;;  %v3397_v49 = vadd.f32 %v3981_v47, %v3791_v38 }
 0x810   :  { %v5021_v53 = vadd.f32 %v4135_v24, %v3386_v59  ;;  %v3389_v62 = vadd.f32 %v3791_v38, %v3388_v29 }
 0x811   :  { %v5040_v31 = vadd.f32 %v4138_v8, %v3397_v49  ;;  %v3410_v46 = vsel %vm50_vm0, %v5026_v48, 0.0  ;;  %v4034_v8 = vld [vmem:[%s5130_s11 + $0x18] sm:$0xff]  }
 0x812   :  { %v5031_v7 = vadd.f32 %v4137_v13, %v3389_v62  ;;  %v3404_v30 = vsel %vm50_vm0, %v5021_v53, 0.0  ;;  %v4031_v13 = vld [vmem:[%s5130_s11] sm:$0xff]  }
 0x813   :  { %3405 = vadd.xlane.f32.xlu0 %v3404_v30  ;;  %v3413_v4 = vsel %vm50_vm0, %v5040_v31, 0.0  ;;  %3990 = vmatprep.subr.bf16.mxu1 %v4031_v13  ;;  %v4032_v30 = vld [vmem:[%s5130_s11 + $0x8] sm:$0xff]  }
 0x814   :  { %v3407_v36 = vsel %vm50_vm0, %v5031_v7, 0.0  ;;  %3991 = vmatpush3.bf16.msra.mxu1 %v4031_v13 }
 0x815   :  { %3408 = vadd.xlane.f32.xlu1 %v3407_v36  ;;  %3992 = vmatprep.subr.bf16.mxu1 %v4032_v30  ;;  %v4033_v36 = vld [vmem:[%s5130_s11 + $0x10] sm:$0xff]  }
 0x817   :  { %3411 = vadd.xlane.f32.xlu0 %v3410_v46  ;;  %v4035_v46 = vld [vmem:[%s5130_s11 + $0x20] sm:$0xff]  }
 0x818   :  { %3993 = vmatpush3.bf16.msra.mxu1 %v4032_v30 }
 0x819   :  { %3994 = vmatprep.subr.bf16.mxu1 %v4033_v36 }
 0x81b   :  { %3414 = vadd.xlane.f32.xlu0 %v3413_v4  ;;  %v4036_v4 = vld [vmem:[%s5130_s11 + $0x28] sm:$0xff]  }
 0x81c   :  { %3995 = vmatpush3.bf16.msra.mxu1 %v4033_v36 }
 0x81d   :  { %3996 = vmatprep.subr.bf16.mxu1 %v4034_v8 }
 0x820   :  { %3997 = vmatpush3.bf16.msra.mxu1 %v4034_v8 }
 0x821   :  { %3998 = vmatprep.subr.bf16.mxu1 %v4035_v46 }
 0x824   :  { %3999 = vmatpush3.bf16.msra.mxu1 %v4035_v46 }
 0x825   :  { %4000 = vmatprep.subr.bf16.mxu1 %v4036_v4 }
 0x828   :  { %4001 = vmatpush3.bf16.msra.mxu1 %v4036_v4 }
 0x8a0   :  { %v3406_v33 = vpop.xlane.xlu0 %3405 }
 0x8a1   :  { %v3416_v12 = vmul.f32 0.03125, %v3406_v33  ;;  %v4037_v33 = vld [vmem:[%s5130_s11 + $0x30] sm:$0xff]  }
 0x8a2   :  { %v3409_v6 = vpop.xlane.xlu1 %3408  ;;  %4002 = vmatprep.subr.bf16.mxu1 %v4037_v33 }
 0x8a3   :  { %v3420_v28 = vsub.f32 %v5021_v53, %v3416_v12  ;;  %v3417_v41 = vmul.f32 0.03125, %v3409_v6  ;;  %4003 = vmatpush3.bf16.msra.mxu1 %v4037_v33  ;;  %v4038_v12 = vld [vmem:[%s5130_s11 + $0x38] sm:$0xff]   ;;  %v3798_v6 = vld [vmem:[%s5129_s10] ss:$0 sm:$0xff] }
 0x8a4   :  { %v3412_v55 = vpop.xlane.xlu0 %3411  ;;  %4004 = vmatprep.subr.bf16.mxu1 %v4038_v12 }
 0x8a5   :  { %v3421_v20 = vsub.f32 %v5031_v7, %v3417_v41  ;;  %v3418_v56 = vmul.f32 0.03125, %v3412_v55  ;;  %v3424_v26 = vmul.f32 %v3420_v28, %v3420_v28 }
 0x8a7   :  { %v3422_v17 = vsub.f32 %v5026_v48, %v3418_v56  ;;  %v3428_v40 = vsel %vm50_vm0, %v3424_v26, 0.0  ;;  %v3425_v5 = vmul.f32 %v3421_v20, %v3421_v20  ;;  %4005 = vmatpush3.bf16.msra.mxu1 %v4038_v12 }
 0x8a8   :  { %3429 = vadd.xlane.f32.xlu0 %v3428_v40  ;;  %v3415_v39 = vpop.xlane.xlu0 %3414 }
 0x8a9   :  { %v3419_v43 = vmul.f32 0.03125, %v3415_v39  ;;  %v3431_v1 = vsel %vm50_vm0, %v3425_v5, 0.0  ;;  %v3426_v16 = vmul.f32 %v3422_v17, %v3422_v17 }
 0x8aa   :  { %3432 = vadd.xlane.f32.xlu1 %v3431_v1 }
 0x8ab   :  { %v3423_v0 = vsub.f32 %v5040_v31, %v3419_v43  ;;  %v3434_v22 = vsel %vm50_vm0, %v3426_v16, 0.0 }
 0x8ac   :  { %3435 = vadd.xlane.f32.xlu0 %v3434_v22 }
 0x8ad   :  { %v3427_v58 = vmul.f32 %v3423_v0, %v3423_v0 }
 0x8af   :  { %v3437_v9 = vsel %vm50_vm0, %v3427_v58, 0.0 }
 0x8b0   :  { %3438 = vadd.xlane.f32.xlu1 %v3437_v9 }
 0x935   :  { %v3430_v32 = vpop.xlane.xlu0 %3429 }
 0x936   :  { %v3440_v45 = vmul.f32 0.03125, %v3430_v32 }
 0x937   :  { %v3433_v18 = vpop.xlane.xlu1 %3432 }
 0x938   :  { %v3444_v25 = vadd.f32 1e-05, %v3440_v45  ;;  %v3441_v52 = vmul.f32 0.03125, %v3433_v18 }
 0x939   :  { %v3436_v15 = vpop.xlane.xlu0 %3435 }
 0x93a   :  { %4111 = vrsqrt.f32 %v3444_v25  ;;  %v3445_v11 = vadd.f32 1e-05, %v3441_v52  ;;  %v3442_v60 = vmul.f32 0.03125, %v3436_v15 }
 0x93c   :  { %4113 = vrsqrt.f32 %v3445_v11  ;;  %v3446_v21 = vadd.f32 1e-05, %v3442_v60 }
 0x93d   :  { %v3439_v61 = vpop.xlane.xlu1 %3438 }
 0x93e   :  { %4115 = vrsqrt.f32 %v3446_v21  ;;  %v3443_v44 = vmul.f32 0.03125, %v3439_v61 }
 0x940   :  { %v3447_v63 = vadd.f32 1e-05, %v3443_v44 }
 0x942   :  { %4117 = vrsqrt.f32 %v3447_v63 }
 0x944   :  { %v4112_v51 = vpop.eup %4111 }
 0x945   :  { %v3452_v50 = vmul.f32 %v4112_v51, %v3420_v28 }
 0x946   :  { %v4114_v35 = vpop.eup %4113 }
 0x947   :  { %v3453_v37 = vmul.f32 %v4114_v35, %v3421_v20  ;;  %v3463_v14 = vmul.f32 %v3796_v23, %v3452_v50  ;;  %v3807_v35 = vld [vmem:[%s5131_s12] ss:$0 sm:$0xff]  ;;  %s4139_s12 = scalar_lea.vmem %s3726_s23, 512 }
 0x948   :  { %v4116_v27 = vpop.eup %4115  ;;  %p4140_p0 = scmp.ne.s32.totalorder %s3726_s23, %s4139_s12  ;;  %p4145_p2 = scmp.lt.s32.totalorder %s4139_s12, %s4139_s12 }
 0x949   :  { %v3454_v3 = vmul.f32 %v4116_v27, %v3422_v17  ;;  %v3464_v38 = vmul.f32 %v3796_v23, %v3453_v37  ;;  %v3474_v54 = vadd.f32 %v3797_v57, %v3463_v14 }
 0x94a   :  { %p4146_p3 = por %p4145_p2, %p4144_p1 }
 0x94b   :  { %v3475_v34 = vadd.f32 %v3797_v57, %v3464_v38  ;;  %v3465_v59 = vmul.f32 %v3796_v23, %v3454_v3 }
 0x94c   :  { %v4118_v19 = vpop.eup %4117  ;;  %p4147_p4 = pnand %p4146_p3, %p4140_p0 }
 0x94d   :  { %v3455_v47 = vmul.f32 %v4118_v19, %v3423_v0  ;;  %v3478_v29 = vpack.c.bf16 %v3475_v34, %v3474_v54  ;;  %v3476_v62 = vadd.f32 %v3797_v57, %v3465_v59 }
 0x94f   :  { %v3466_v24 = vmul.f32 %v3796_v23, %v3455_v47  ;;  %3986 = vmatprep.mubr.msk.bf16.mxu0 %vm50_vm0, %v3478_v29 }
 0x951   :  { %v3477_v2 = vadd.f32 %v3797_v57, %v3466_v24 }
 0x953   :  { %v3479_v49 = vpack.c.bf16 %v3477_v2, %v3476_v62 }
 0x955   :  { %3987 = vmatmul.mubr.msk.bf16.vlgmr.msra.gmra.mrb[40].mxu0 %vm50_vm0, %v3479_v49 }
 0xa28   :  { %v3988_v28 = vpop.f32.mrb[40].mxu0 }
 0xa29   :  { %v3552_v41 = vadd.f32 %v3988_v28, %v3798_v6  ;;  %v3543_v55 = vpop.f32.mrb[41].mxu0 }
 0xa2a   :  { %v3544_v20 = vadd.f32 %v3798_v6, %v3543_v55  ;;  %v3989_v56 = vpop.f32.mrb[42].mxu0 }
 0xa2b   :  { %v3805_v26 = vmul.f32 -1.702, %v3552_v41  ;;  %v3555_v17 = vadd.f32 %v3989_v56, %v3798_v6  ;;  %v3546_v40 = vpop.f32.mrb[43].mxu0 }
 0xa2c   :  { %v3803_v5 = vmul.f32 -1.702, %v3544_v20  ;;  %v3547_v39 = vadd.f32 %v3798_v6, %v3546_v40 }
 0xa2d   :  { %v3570_v43 = vmul.f32 1.442695, %v3805_v26  ;;  %v3806_v1 = vmul.f32 -1.702, %v3555_v17 }
 0xa2e   :  { %v3566_v16 = vmul.f32 1.442695, %v3803_v5  ;;  %v3804_v0 = vmul.f32 -1.702, %v3547_v39 }
 0xa2f   :  { %4119 = vpow2.f32 %v3570_v43  ;;  %v3572_v22 = vmul.f32 1.442695, %v3806_v1 }
 0xa30   :  { %4121 = vpow2.f32 %v3566_v16  ;;  %v3568_v58 = vmul.f32 1.442695, %v3804_v0 }
 0xa31   :  { %4123 = vpow2.f32 %v3572_v22 }
 0xa32   :  { %4125 = vpow2.f32 %v3568_v58 }
 0xa39   :  { %v4120_v9 = vpop.eup %4119 }
 0xa3a   :  { %v4122_v10 = vpop.eup %4121  ;;  %v3576_v42 = vadd.f32 1.0, %v4120_v9 }
 0xa3b   :  { %v4124_v32 = vpop.eup %4123  ;;  %v3574_v45 = vadd.f32 1.0, %v4122_v10 }
 0xa3c   :  { %v4126_v18 = vpop.eup %4125  ;;  %4127 = vrcp.f32 %v3576_v42  ;;  %v3577_v25 = vadd.f32 1.0, %v4124_v32 }
 0xa3d   :  { %4129 = vrcp.f32 %v3574_v45  ;;  %v3575_v52 = vadd.f32 1.0, %v4126_v18 }
 0xa3e   :  { %4131 = vrcp.f32 %v3577_v25 }
 0xa3f   :  { %4133 = vrcp.f32 %v3575_v52 }
 0xa46   :  { %v4128_v15 = vpop.eup %4127 }
 0xa47   :  { %v4130_v11 = vpop.eup %4129  ;;  %v3588_v61 = vmul.f32 %v4128_v15, %v3552_v41 }
 0xa48   :  { %v4132_v60 = vpop.eup %4131  ;;  %v3586_v63 = vmul.f32 %v4130_v11, %v3544_v20 }
 0xa49   :  { %v4134_v21 = vpop.eup %4133  ;;  %v3589_v44 = vmul.f32 %v4132_v60, %v3555_v17 }
 0xa4a   :  { %v3587_v51 = vmul.f32 %v4134_v21, %v3547_v39 }
 0xa4b   :  { %v3591_v23 = vpack.c.bf16 %v3589_v44, %v3588_v61 }
 0xa4c   :  { %v3590_v50 = vpack.c.bf16 %v3587_v51, %v3586_v63 }
 0xa4e   :  { %4006 = vmatprep.mubr.bf16.mxu1 %v3590_v50 }
 0xa4f   :  { %4007 = vmatmul.mubr.bf16.vlgmr.msra.gmra.mrb[32].mxu1 %v3591_v23 }
 0xb22   :  { %v4008_v37 = vpop.f32.mrb[32].mxu1 }
 0xb23   :  { %v3706_v14 = vadd.f32 %v4008_v37, %v3807_v35  ;;  %v3697_v27 = vpop.f32.mrb[33].mxu1 }
 0xb24   :  { %v3698_v57 = vadd.f32 %v3807_v35, %v3697_v27  ;;  %v4009_v3 = vpop.f32.mrb[34].mxu1 }
 0xb25   :  { %v3714_v38 = vadd.f32 %v3706_v14, %v5026_v48  ;;  %v3709_v54 = vadd.f32 %v4009_v3, %v3807_v35  ;;  %v3700_v34 = vpop.f32.mrb[35].mxu1 }
 0xb26   :  { %v3712_v19 = vadd.f32 %v3698_v57, %v5021_v53  ;;  %v3701_v59 = vadd.f32 %v3807_v35, %v3700_v34 }
 0xb27   :  { %3718 = vst.msk [vmem:[#allocation2 + $0x10] sm:$0xff] %vm50_vm0, %v3714_v38  ;;  %v3715_v47 = vadd.f32 %v3709_v54, %v5040_v31 }
 0xb28   :  { %3716 = vst.msk [vmem:[#allocation2] sm:$0xff] %vm50_vm0, %v3712_v19  ;;  %v3713_v29 = vadd.f32 %v3701_v59, %v5031_v7 }
 0xb29   :  { %3719 = vst.msk [vmem:[#allocation2 + $0x18] sm:$0xff] %vm50_vm0, %v3715_v47 }
 0xb2a   :  { %3717 = vst.msk [vmem:[#allocation2 + $0x8] sm:$0xff] %vm50_vm0, %v3713_v29 }
 0xb2b   :  { %4150 = shalt.err (!%p4147_p4)
}
 0xb2c   :  { %s4151_s9 = scalar_lea.hbm %s5132_s13, 512 }
 0xb2d   :  { %p4152_p5 = scmp.ne.s32.totalorder %s5132_s13, %s4151_s9  ;;  %p4155_p6 = scmp.lt.u32.totalorder %s4151_s9, %s5132_s13 }
 0xb2f   :  { %p4157_p7 = pnand %p4155_p6, %p4152_p5 }
 0xb31   :  { %4160 = shalt.err (!%p4157_p7)
}
 0xb32   :  { %s4177_s27 = smov 128  }
 0xb33   :  { %3731 = dma.vmem_to_hbm [thread:$0]  %s3726_s23, 512, %s5132_s13, [#allocation3], %s4177_s27, %s4177_s27, %s4174_s28  }
 0xb34   :  { %4161 = dma.done.wait [#allocation3], 512  }
 0xb35   :  { %4162 = vsyncadd [#allocation3], 4294966784 }
 0xb36   :  { %3735 = vsyncpa [#allocation3], 1 }

</bundles_post_ra>
